<compile_context>
chip_gen: v7x
topology: tpu7x:2x2x1
jax: 0.10.0
libtpu: 0.0.40
codegen_flags: <defaults>
</compile_context>

<pallas_src>
import functools
import math

import jax
import jax.numpy as jnp
from jax import lax
from jax.experimental import pallas as pl
from jax.experimental.pallas import tpu as pltpu

# ---------------- config (small, consistent with the module) ----------------
VOCAB_SIZE = 128
BLOCK_SIZE = 16     # max sequence length
N_LAYER = 2
N_HEAD = 4
N_EMBD = 32
LN_EPS = 1e-5
NEG_BIG = -1e30     # finite "-inf" for the causal mask (NaN-safe)


# ----------------------------- kernel helpers -------------------------------
def _layernorm(x, g, b):
    # x: (M, C); g, b: (1, C)
    mu = jnp.mean(x, axis=-1, keepdims=True)
    var = jnp.mean(jnp.square(x - mu), axis=-1, keepdims=True)
    return (x - mu) * lax.rsqrt(var + LN_EPS) * g + b


def _gelu_tanh(x):
    # GELU (tanh approximation), as used by nanoGPT / GPT-2 MLP.
    c = math.sqrt(2.0 / math.pi)
    return 0.5 * x * (1.0 + jnp.tanh(c * (x + 0.044715 * x * x * x)))


# ------------------------- fused full-forward kernel ------------------------
def fused_gpt_kernel(tok_ref, pos_ref, norms_ref, wqkv_ref, wap_ref,
                     wfc_ref, wmp_ref, bias_ref, wte_t_ref, out_ref,
                     *, n_layer, n_head, batch, seq):
    B, T, H = batch, seq, n_head
    BT, C = tok_ref.shape
    hd = C // H
    scale = 1.0 / math.sqrt(hd)

    # fused embedding add: broadcast pos over the batch (pure VPU, no concat)
    x = (tok_ref[...].reshape(B, T, C) + pos_ref[...][None, :, :]).reshape(BT, C)

    # causal additive bias, built once and reused by every layer
    row = lax.broadcasted_iota(jnp.int32, (T, T), 0)
    col = lax.broadcasted_iota(jnp.int32, (T, T), 1)
    causal_bias = jnp.where(col <= row, 0.0, NEG_BIG).astype(jnp.float32)

    for l in range(n_layer):                          # static unroll, L=2
        ln1 = norms_ref[2 * l]                        # (2, C): [gamma; beta]
        ln2 = norms_ref[2 * l + 1]
        b_all = bias_ref[l]                           # (3, 4C) packed biases
        b_qkv = b_all[0:1, 0:3 * C]                   # (1, 3C)
        b_fc = b_all[1:2, :]                          # (1, 4C)
        b_ap = b_all[2:3, 0:C]                        # (1, C)
        b_mp = b_all[2:3, C:2 * C]                    # (1, C)

        # ---- attention branch: x = x + attn(ln_1(x)) ----
        xn = _layernorm(x, ln1[0:1, :], ln1[1:2, :])                 # (BT, C)
        # fused QKV projection: one near-lane-dense (BT,C)@(C,3C) MXU pass
        qkv = jnp.dot(xn, wqkv_ref[l],
                      preferred_element_type=jnp.float32) + b_qkv    # (BT,3C)
        q3 = qkv[:, 0:C].reshape(B, T, C)
        k3 = qkv[:, C:2 * C].reshape(B, T, C)
        v3 = qkv[:, 2 * C:3 * C].reshape(B, T, C)

        head_outs = []
        for h in range(H):                            # static, H=4
            lo, hi = h * hd, (h + 1) * hd
            qh, kh, vh = q3[:, :, lo:hi], k3[:, :, lo:hi], v3[:, :, lo:hi]
            s = jnp.einsum('btd,bsd->bts', qh, kh,
                           preferred_element_type=jnp.float32) * scale
            s = s + causal_bias[None, :, :]
            s = s - jnp.max(s, axis=-1, keepdims=True)
            p = jnp.exp(s)
            p = p / jnp.sum(p, axis=-1, keepdims=True)    # exact softmax
            head_outs.append(jnp.einsum('bts,bsd->btd', p, vh,
                                        preferred_element_type=jnp.float32))
        # heads concatenated along lanes -> ONE output-proj matmul; the head
        # sum is folded into the MXU contraction over C = H*hd.
        y = jnp.concatenate(head_outs, axis=-1).reshape(BT, C)       # (BT, C)
        x = x + jnp.dot(y, wap_ref[l],
                        preferred_element_type=jnp.float32) + b_ap

        # ---- MLP branch: x = x + mlp(ln_2(x)) ----
        xn2 = _layernorm(x, ln2[0:1, :], ln2[1:2, :])
        h1 = _gelu_tanh(jnp.dot(xn2, wfc_ref[l],
                                preferred_element_type=jnp.float32) + b_fc)
        x = x + jnp.dot(h1, wmp_ref[l],
                        preferred_element_type=jnp.float32) + b_mp

    # ---- final LayerNorm + tied lm_head (pre-transposed (C, V) weight) ----
    lnf = norms_ref[2 * n_layer]
    xf = _layernorm(x, lnf[0:1, :], lnf[1:2, :])
    out_ref[...] = jnp.dot(xf, wte_t_ref[...],
                           preferred_element_type=jnp.float32)        # (BT, V)


# ------------------------------ parameters ----------------------------------
def init_params(key):
    std = 0.02
    C, L, V = N_EMBD, N_LAYER, VOCAB_SIZE
    ks = jax.random.split(key, 6)
    # ln1[l], ln2[l] for each layer, then ln_f; each entry is [gamma; beta]
    norms = jnp.stack([jnp.ones((2 * L + 1, C), jnp.float32),
                       jnp.zeros((2 * L + 1, C), jnp.float32)], axis=1)
    params = {
        "wte": std * jax.random.normal(ks[0], (V, C), jnp.float32),
        "wpe": std * jax.random.normal(ks[1], (BLOCK_SIZE, C), jnp.float32),
        "norms": norms,                                        # (2L+1, 2, C)
        # weights stored (in, out) so the kernel does x @ W == x @ weight.T
        # (PyTorch Linear).  QKV packed along the output/lane axis:
        # lanes [0:C]=Q, [C:2C]=K, [2C:3C]=V, head-major within each block.
        "w_qkv": std * jax.random.normal(ks[2], (L, C, 3 * C), jnp.float32),
        "w_ap": std * jax.random.normal(ks[3], (L, C, C), jnp.float32),
        "w_fc": std * jax.random.normal(ks[4], (L, C, 4 * C), jnp.float32),
        "w_mp": std * jax.random.normal(ks[5], (L, 4 * C, C), jnp.float32),
        # all linear biases packed into one slab (rows: qkv | fc | [ap, mp]);
        # zero-init matches nn.Linear bias init in _init_weights.
        "biases": jnp.zeros((L, 3, 4 * C), jnp.float32),
    }
    return params


# ------------------------------ forward pass ---------------------------------
def ranmanujan_forward(params, idx, targets=None):
    B, T = idx.shape
    assert T <= BLOCK_SIZE, f"Cannot forward sequence of length {T}"
    C, V, H, L = N_EMBD, VOCAB_SIZE, N_HEAD, N_LAYER

    # Embedding gather and the tied-weight transpose are glue, kept in JAX.
    tok = jnp.take(params["wte"], idx.reshape(-1), axis=0)    # (B*T, C)
    pos = params["wpe"][:T]                                   # (T, C)
    wte_t = params["wte"].T                                    # (C, V), tied

    args = (tok, pos, params["norms"], params["w_qkv"], params["w_ap"],
            params["w_fc"], params["w_mp"], params["biases"], wte_t)

    kern = functools.partial(fused_gpt_kernel, n_layer=L, n_head=H,
                             batch=B, seq=T)
    # single invocation (no grid): every slab is a full-array VMEM resident,
    # no grid-loop scaffolding and no pointless double-buffering.
    logits2d = pl.pallas_call(
        kern,
        out_shape=jax.ShapeDtypeStruct((B * T, V), jnp.float32),
        in_specs=[pl.BlockSpec(memory_space=pltpu.MemorySpace.VMEM)
                  for _ in args],
        out_specs=pl.BlockSpec(memory_space=pltpu.MemorySpace.VMEM),
    )(*args)
    logits = logits2d.reshape(B, T, V)

    loss = None
    if targets is not None:
        lse = jax.nn.logsumexp(logits, axis=-1)
        picked = jnp.take_along_axis(logits, targets[..., None], axis=-1)[..., 0]
        loss = jnp.mean(lse - picked)
    return logits, loss


# --------------------------------- main --------------------------------------
if __name__ == "__main__":
    key = jax.random.PRNGKey(0)
    pkey, ikey = jax.random.split(key)
    params = init_params(pkey)

    B, T = 2, 8
    idx = jax.random.randint(ikey, (B, T), 0, VOCAB_SIZE, dtype=jnp.int32)

    logits, loss = ranmanujan_forward(params, idx, targets=None)
    logits = jax.block_until_ready(logits)

    assert logits.shape == (B, T, VOCAB_SIZE)
    assert logits.dtype == jnp.float32
    assert bool(jnp.all(jnp.isfinite(logits)))
    print("KERNEL_OK")
</pallas_src>

<mosaic_0001>
module attributes {stable_mosaic.version = 11 : i64} {
  func.func @fused_gpt_kernel(%arg0: memref<16x32xf32, #tpu.memory_space<vmem>>, %arg1: memref<8x32xf32, #tpu.memory_space<vmem>>, %arg2: memref<5x2x32xf32, #tpu.memory_space<vmem>>, %arg3: memref<2x32x96xf32, #tpu.memory_space<vmem>>, %arg4: memref<2x32x32xf32, #tpu.memory_space<vmem>>, %arg5: memref<2x32x128xf32, #tpu.memory_space<vmem>>, %arg6: memref<2x128x32xf32, #tpu.memory_space<vmem>>, %arg7: memref<2x3x128xf32, #tpu.memory_space<vmem>>, %arg8: memref<32x128xf32, #tpu.memory_space<vmem>>, %arg9: memref<16x128xf32, #tpu.memory_space<vmem>>) attributes {dimension_semantics = [], scalar_prefetch = 0 : i64, scratch_operands = 0 : i64, tpu.core_type = #tpu.core_type<tc>} {
    %c0 = arith.constant 0 : index
    %c0_0 = arith.constant 0 : index
    %0 = vector.load %arg0[%c0, %c0_0] : memref<16x32xf32, #tpu.memory_space<vmem>>, vector<16x32xf32>
    %1 = vector.shape_cast %0 : vector<16x32xf32> to vector<2x8x32xf32>
    %c0_1 = arith.constant 0 : index
    %c0_2 = arith.constant 0 : index
    %2 = vector.load %arg1[%c0_1, %c0_2] : memref<8x32xf32, #tpu.memory_space<vmem>>, vector<8x32xf32>
    %3 = vector.shape_cast %2 : vector<8x32xf32> to vector<1x8x32xf32>
    %4 = vector.broadcast %3 : vector<1x8x32xf32> to vector<2x8x32xf32>
    %5 = arith.addf %1, %4 : vector<2x8x32xf32>
    %6 = vector.shape_cast %5 : vector<2x8x32xf32> to vector<16x32xf32>
    %7 = tpu.iota {dimensions = array<i32: 0>} : vector<8x8xi32>
    %8 = tpu.iota {dimensions = array<i32: 1>} : vector<8x8xi32>
    %9 = arith.cmpi sle, %8, %7 : vector<8x8xi32>
    %cst = arith.constant 0.000000e+00 : f32
    %cst_3 = arith.constant -1.000000e+30 : f32
    %10 = vector.broadcast %cst : f32 to vector<8x8xf32>
    %11 = vector.broadcast %cst_3 : f32 to vector<8x8xf32>
    %12 = arith.select %9, %10, %11 : vector<8x8xi1>, vector<8x8xf32>
    %c0_4 = arith.constant 0 : index
    %c0_5 = arith.constant 0 : index
    %c0_6 = arith.constant 0 : index
    %13 = vector.load %arg2[%c0_4, %c0_5, %c0_6] : memref<5x2x32xf32, #tpu.memory_space<vmem>>, vector<1x2x32xf32>
    %14 = vector.shape_cast %13 : vector<1x2x32xf32> to vector<2x32xf32>
    %c1 = arith.constant 1 : index
    %c0_7 = arith.constant 0 : index
    %c0_8 = arith.constant 0 : index
    %15 = vector.load %arg2[%c1, %c0_7, %c0_8] : memref<5x2x32xf32, #tpu.memory_space<vmem>>, vector<1x2x32xf32>
    %16 = vector.shape_cast %15 : vector<1x2x32xf32> to vector<2x32xf32>
    %c0_9 = arith.constant 0 : index
    %c0_10 = arith.constant 0 : index
    %c0_11 = arith.constant 0 : index
    %17 = vector.load %arg7[%c0_9, %c0_10, %c0_11] : memref<2x3x128xf32, #tpu.memory_space<vmem>>, vector<1x3x128xf32>
    %18 = vector.shape_cast %17 : vector<1x3x128xf32> to vector<3x128xf32>
    %19 = vector.extract_strided_slice %18 {offsets = [0, 0], sizes = [1, 96], strides = [1, 1]} : vector<3x128xf32> to vector<1x96xf32>
    %20 = vector.extract_strided_slice %18 {offsets = [1, 0], sizes = [1, 128], strides = [1, 1]} : vector<3x128xf32> to vector<1x128xf32>
    %21 = vector.extract_strided_slice %18 {offsets = [2, 0], sizes = [1, 32], strides = [1, 1]} : vector<3x128xf32> to vector<1x32xf32>
    %22 = vector.extract_strided_slice %18 {offsets = [2, 32], sizes = [1, 32], strides = [1, 1]} : vector<3x128xf32> to vector<1x32xf32>
    %23 = vector.extract_strided_slice %14 {offsets = [0, 0], sizes = [1, 32], strides = [1, 1]} : vector<2x32xf32> to vector<1x32xf32>
    %24 = vector.extract_strided_slice %14 {offsets = [1, 0], sizes = [1, 32], strides = [1, 1]} : vector<2x32xf32> to vector<1x32xf32>
    %cst_12 = arith.constant dense<0.000000e+00> : vector<16xf32>
    %25 = vector.multi_reduction <add>, %6, %cst_12 [1] : vector<16x32xf32> to vector<16xf32>
    %26 = vector.shape_cast %25 : vector<16xf32> to vector<16x1xf32>
    %cst_13 = arith.constant 3.200000e+01 : f32
    %27 = vector.broadcast %cst_13 : f32 to vector<16x1xf32>
    %28 = arith.divf %26, %27 : vector<16x1xf32>
    %29 = vector.broadcast %28 : vector<16x1xf32> to vector<16x32xf32>
    %30 = arith.subf %6, %29 : vector<16x32xf32>
    %31 = arith.mulf %30, %30 : vector<16x32xf32>
    %cst_14 = arith.constant dense<0.000000e+00> : vector<16xf32>
    %32 = vector.multi_reduction <add>, %31, %cst_14 [1] : vector<16x32xf32> to vector<16xf32>
    %33 = vector.shape_cast %32 : vector<16xf32> to vector<16x1xf32>
    %cst_15 = arith.constant 3.200000e+01 : f32
    %34 = vector.broadcast %cst_15 : f32 to vector<16x1xf32>
    %35 = arith.divf %33, %34 : vector<16x1xf32>
    %36 = vector.broadcast %28 : vector<16x1xf32> to vector<16x32xf32>
    %37 = arith.subf %6, %36 : vector<16x32xf32>
    %cst_16 = arith.constant 9.99999974E-6 : f32
    %38 = vector.broadcast %cst_16 : f32 to vector<16x1xf32>
    %39 = arith.addf %35, %38 : vector<16x1xf32>
    %40 = math.rsqrt %39 : vector<16x1xf32>
    %41 = vector.broadcast %40 : vector<16x1xf32> to vector<16x32xf32>
    %42 = arith.mulf %37, %41 : vector<16x32xf32>
    %43 = vector.broadcast %23 : vector<1x32xf32> to vector<16x32xf32>
    %44 = arith.mulf %42, %43 : vector<16x32xf32>
    %45 = vector.broadcast %24 : vector<1x32xf32> to vector<16x32xf32>
    %46 = arith.addf %44, %45 : vector<16x32xf32>
    %c0_17 = arith.constant 0 : index
    %c0_18 = arith.constant 0 : index
    %c0_19 = arith.constant 0 : index
    %47 = vector.load %arg3[%c0_17, %c0_18, %c0_19] : memref<2x32x96xf32, #tpu.memory_space<vmem>>, vector<1x32x96xf32>
    %48 = vector.shape_cast %47 : vector<1x32x96xf32> to vector<32x96xf32>
    %cst_20 = arith.constant dense<0.000000e+00> : vector<16x96xf32>
    %49 = tpu.matmul %46, %48, %cst_20 {dimension_numbers = #tpu.dot_dimension_numbers<[1], [0], [0], [1], [0, 0, 1, 1], [], []>} : vector<16x32xf32>, vector<32x96xf32>, vector<16x96xf32> -> vector<16x96xf32>
    %50 = vector.broadcast %19 : vector<1x96xf32> to vector<16x96xf32>
    %51 = arith.addf %49, %50 : vector<16x96xf32>
    %52 = vector.extract_strided_slice %51 {offsets = [0, 0], sizes = [16, 32], strides = [1, 1]} : vector<16x96xf32> to vector<16x32xf32>
    %53 = vector.shape_cast %52 : vector<16x32xf32> to vector<2x8x32xf32>
    %54 = vector.extract_strided_slice %51 {offsets = [0, 32], sizes = [16, 32], strides = [1, 1]} : vector<16x96xf32> to vector<16x32xf32>
    %55 = vector.shape_cast %54 : vector<16x32xf32> to vector<2x8x32xf32>
    %56 = vector.extract_strided_slice %51 {offsets = [0, 64], sizes = [16, 32], strides = [1, 1]} : vector<16x96xf32> to vector<16x32xf32>
    %57 = vector.shape_cast %56 : vector<16x32xf32> to vector<2x8x32xf32>
    %58 = vector.extract_strided_slice %53 {offsets = [0, 0, 0], sizes = [2, 8, 8], strides = [1, 1, 1]} : vector<2x8x32xf32> to vector<2x8x8xf32>
    %59 = vector.extract_strided_slice %55 {offsets = [0, 0, 0], sizes = [2, 8, 8], strides = [1, 1, 1]} : vector<2x8x32xf32> to vector<2x8x8xf32>
    %60 = vector.extract_strided_slice %57 {offsets = [0, 0, 0], sizes = [2, 8, 8], strides = [1, 1, 1]} : vector<2x8x32xf32> to vector<2x8x8xf32>
    "tpu.trace_start"() <{level = 10 : i32, message = "btd,bsd->bts"}> : () -> ()
    %cst_21 = arith.constant dense<0.000000e+00> : vector<2x8x8xf32>
    %61 = tpu.matmul %58, %59, %cst_21 {dimension_numbers = #tpu.dot_dimension_numbers<[2], [2], [1], [1], [0, 0, 0, 1, 1, 1], [0], [0]>} : vector<2x8x8xf32>, vector<2x8x8xf32>, vector<2x8x8xf32> -> vector<2x8x8xf32>
    "tpu.trace_stop"() : () -> ()
    %cst_22 = arith.constant 0.353553385 : f32
    %62 = vector.broadcast %cst_22 : f32 to vector<2x8x8xf32>
    %63 = arith.mulf %61, %62 : vector<2x8x8xf32>
    %64 = vector.shape_cast %12 : vector<8x8xf32> to vector<1x8x8xf32>
    %65 = vector.broadcast %64 : vector<1x8x8xf32> to vector<2x8x8xf32>
    %66 = arith.addf %63, %65 : vector<2x8x8xf32>
    %cst_23 = arith.constant dense<0xFF800000> : vector<2x8xf32>
    %67 = vector.multi_reduction <maximumf>, %66, %cst_23 [2] : vector<2x8x8xf32> to vector<2x8xf32>
    %68 = vector.shape_cast %67 : vector<2x8xf32> to vector<2x8x1xf32>
    %69 = vector.broadcast %68 : vector<2x8x1xf32> to vector<2x8x8xf32>
    %70 = arith.subf %66, %69 : vector<2x8x8xf32>
    %71 = math.exp %70 : vector<2x8x8xf32>
    %cst_24 = arith.constant dense<0.000000e+00> : vector<2x8xf32>
    %72 = vector.multi_reduction <add>, %71, %cst_24 [2] : vector<2x8x8xf32> to vector<2x8xf32>
    %73 = vector.shape_cast %72 : vector<2x8xf32> to vector<2x8x1xf32>
    %74 = vector.broadcast %73 : vector<2x8x1xf32> to vector<2x8x8xf32>
    %75 = arith.divf %71, %74 : vector<2x8x8xf32>
    "tpu.trace_start"() <{level = 10 : i32, message = "bts,bsd->btd"}> : () -> ()
    %cst_25 = arith.constant dense<0.000000e+00> : vector<2x8x8xf32>
    %76 = tpu.matmul %75, %60, %cst_25 {dimension_numbers = #tpu.dot_dimension_numbers<[2], [1], [1], [2], [0, 0, 0, 1, 1, 2], [0], [0]>} : vector<2x8x8xf32>, vector<2x8x8xf32>, vector<2x8x8xf32> -> vector<2x8x8xf32>
    "tpu.trace_stop"() : () -> ()
    %77 = vector.extract_strided_slice %53 {offsets = [0, 0, 8], sizes = [2, 8, 8], strides = [1, 1, 1]} : vector<2x8x32xf32> to vector<2x8x8xf32>
    %78 = vector.extract_strided_slice %55 {offsets = [0, 0, 8], sizes = [2, 8, 8], strides = [1, 1, 1]} : vector<2x8x32xf32> to vector<2x8x8xf32>
    %79 = vector.extract_strided_slice %57 {offsets = [0, 0, 8], sizes = [2, 8, 8], strides = [1, 1, 1]} : vector<2x8x32xf32> to vector<2x8x8xf32>
    "tpu.trace_start"() <{level = 10 : i32, message = "btd,bsd->bts"}> : () -> ()
    %cst_26 = arith.constant dense<0.000000e+00> : vector<2x8x8xf32>
    %80 = tpu.matmul %77, %78, %cst_26 {dimension_numbers = #tpu.dot_dimension_numbers<[2], [2], [1], [1], [0, 0, 0, 1, 1, 1], [0], [0]>} : vector<2x8x8xf32>, vector<2x8x8xf32>, vector<2x8x8xf32> -> vector<2x8x8xf32>
    "tpu.trace_stop"() : () -> ()
    %cst_27 = arith.constant 0.353553385 : f32
    %81 = vector.broadcast %cst_27 : f32 to vector<2x8x8xf32>
    %82 = arith.mulf %80, %81 : vector<2x8x8xf32>
    %83 = vector.shape_cast %12 : vector<8x8xf32> to vector<1x8x8xf32>
    %84 = vector.broadcast %83 : vector<1x8x8xf32> to vector<2x8x8xf32>
    %85 = arith.addf %82, %84 : vector<2x8x8xf32>
    %cst_28 = arith.constant dense<0xFF800000> : vector<2x8xf32>
    %86 = vector.multi_reduction <maximumf>, %85, %cst_28 [2] : vector<2x8x8xf32> to vector<2x8xf32>
    %87 = vector.shape_cast %86 : vector<2x8xf32> to vector<2x8x1xf32>
    %88 = vector.broadcast %87 : vector<2x8x1xf32> to vector<2x8x8xf32>
    %89 = arith.subf %85, %88 : vector<2x8x8xf32>
    %90 = math.exp %89 : vector<2x8x8xf32>
    %cst_29 = arith.constant dense<0.000000e+00> : vector<2x8xf32>
    %91 = vector.multi_reduction <add>, %90, %cst_29 [2] : vector<2x8x8xf32> to vector<2x8xf32>
    %92 = vector.shape_cast %91 : vector<2x8xf32> to vector<2x8x1xf32>
    %93 = vector.broadcast %92 : vector<2x8x1xf32> to vector<2x8x8xf32>
    %94 = arith.divf %90, %93 : vector<2x8x8xf32>
    "tpu.trace_start"() <{level = 10 : i32, message = "bts,bsd->btd"}> : () -> ()
    %cst_30 = arith.constant dense<0.000000e+00> : vector<2x8x8xf32>
    %95 = tpu.matmul %94, %79, %cst_30 {dimension_numbers = #tpu.dot_dimension_numbers<[2], [1], [1], [2], [0, 0, 0, 1, 1, 2], [0], [0]>} : vector<2x8x8xf32>, vector<2x8x8xf32>, vector<2x8x8xf32> -> vector<2x8x8xf32>
    "tpu.trace_stop"() : () -> ()
    %96 = vector.extract_strided_slice %53 {offsets = [0, 0, 16], sizes = [2, 8, 8], strides = [1, 1, 1]} : vector<2x8x32xf32> to vector<2x8x8xf32>
    %97 = vector.extract_strided_slice %55 {offsets = [0, 0, 16], sizes = [2, 8, 8], strides = [1, 1, 1]} : vector<2x8x32xf32> to vector<2x8x8xf32>
    %98 = vector.extract_strided_slice %57 {offsets = [0, 0, 16], sizes = [2, 8, 8], strides = [1, 1, 1]} : vector<2x8x32xf32> to vector<2x8x8xf32>
    "tpu.trace_start"() <{level = 10 : i32, message = "btd,bsd->bts"}> : () -> ()
    %cst_31 = arith.constant dense<0.000000e+00> : vector<2x8x8xf32>
    %99 = tpu.matmul %96, %97, %cst_31 {dimension_numbers = #tpu.dot_dimension_numbers<[2], [2], [1], [1], [0, 0, 0, 1, 1, 1], [0], [0]>} : vector<2x8x8xf32>, vector<2x8x8xf32>, vector<2x8x8xf32> -> vector<2x8x8xf32>
    "tpu.trace_stop"() : () -> ()
    %cst_32 = arith.constant 0.353553385 : f32
    %100 = vector.broadcast %cst_32 : f32 to vector<2x8x8xf32>
    %101 = arith.mulf %99, %100 : vector<2x8x8xf32>
    %102 = vector.shape_cast %12 : vector<8x8xf32> to vector<1x8x8xf32>
    %103 = vector.broadcast %102 : vector<1x8x8xf32> to vector<2x8x8xf32>
    %104 = arith.addf %101, %103 : vector<2x8x8xf32>
    %cst_33 = arith.constant dense<0xFF800000> : vector<2x8xf32>
    %105 = vector.multi_reduction <maximumf>, %104, %cst_33 [2] : vector<2x8x8xf32> to vector<2x8xf32>
    %106 = vector.shape_cast %105 : vector<2x8xf32> to vector<2x8x1xf32>
    %107 = vector.broadcast %106 : vector<2x8x1xf32> to vector<2x8x8xf32>
    %108 = arith.subf %104, %107 : vector<2x8x8xf32>
    %109 = math.exp %108 : vector<2x8x8xf32>
    %cst_34 = arith.constant dense<0.000000e+00> : vector<2x8xf32>
    %110 = vector.multi_reduction <add>, %109, %cst_34 [2] : vector<2x8x8xf32> to vector<2x8xf32>
    %111 = vector.shape_cast %110 : vector<2x8xf32> to vector<2x8x1xf32>
    %112 = vector.broadcast %111 : vector<2x8x1xf32> to vector<2x8x8xf32>
    %113 = arith.divf %109, %112 : vector<2x8x8xf32>
    "tpu.trace_start"() <{level = 10 : i32, message = "bts,bsd->btd"}> : () -> ()
    %cst_35 = arith.constant dense<0.000000e+00> : vector<2x8x8xf32>
    %114 = tpu.matmul %113, %98, %cst_35 {dimension_numbers = #tpu.dot_dimension_numbers<[2], [1], [1], [2], [0, 0, 0, 1, 1, 2], [0], [0]>} : vector<2x8x8xf32>, vector<2x8x8xf32>, vector<2x8x8xf32> -> vector<2x8x8xf32>
    "tpu.trace_stop"() : () -> ()
    %115 = vector.extract_strided_slice %53 {offsets = [0, 0, 24], sizes = [2, 8, 8], strides = [1, 1, 1]} : vector<2x8x32xf32> to vector<2x8x8xf32>
    %116 = vector.extract_strided_slice %55 {offsets = [0, 0, 24], sizes = [2, 8, 8], strides = [1, 1, 1]} : vector<2x8x32xf32> to vector<2x8x8xf32>
    %117 = vector.extract_strided_slice %57 {offsets = [0, 0, 24], sizes = [2, 8, 8], strides = [1, 1, 1]} : vector<2x8x32xf32> to vector<2x8x8xf32>
    "tpu.trace_start"() <{level = 10 : i32, message = "btd,bsd->bts"}> : () -> ()
    %cst_36 = arith.constant dense<0.000000e+00> : vector<2x8x8xf32>
    %118 = tpu.matmul %115, %116, %cst_36 {dimension_numbers = #tpu.dot_dimension_numbers<[2], [2], [1], [1], [0, 0, 0, 1, 1, 1], [0], [0]>} : vector<2x8x8xf32>, vector<2x8x8xf32>, vector<2x8x8xf32> -> vector<2x8x8xf32>
    "tpu.trace_stop"() : () -> ()
    %cst_37 = arith.constant 0.353553385 : f32
    %119 = vector.broadcast %cst_37 : f32 to vector<2x8x8xf32>
    %120 = arith.mulf %118, %119 : vector<2x8x8xf32>
    %121 = vector.shape_cast %12 : vector<8x8xf32> to vector<1x8x8xf32>
    %122 = vector.broadcast %121 : vector<1x8x8xf32> to vector<2x8x8xf32>
    %123 = arith.addf %120, %122 : vector<2x8x8xf32>
    %cst_38 = arith.constant dense<0xFF800000> : vector<2x8xf32>
    %124 = vector.multi_reduction <maximumf>, %123, %cst_38 [2] : vector<2x8x8xf32> to vector<2x8xf32>
    %125 = vector.shape_cast %124 : vector<2x8xf32> to vector<2x8x1xf32>
    %126 = vector.broadcast %125 : vector<2x8x1xf32> to vector<2x8x8xf32>
    %127 = arith.subf %123, %126 : vector<2x8x8xf32>
    %128 = math.exp %127 : vector<2x8x8xf32>
    %cst_39 = arith.constant dense<0.000000e+00> : vector<2x8xf32>
    %129 = vector.multi_reduction <add>, %128, %cst_39 [2] : vector<2x8x8xf32> to vector<2x8xf32>
    %130 = vector.shape_cast %129 : vector<2x8xf32> to vector<2x8x1xf32>
    %131 = vector.broadcast %130 : vector<2x8x1xf32> to vector<2x8x8xf32>
    %132 = arith.divf %128, %131 : vector<2x8x8xf32>
    "tpu.trace_start"() <{level = 10 : i32, message = "bts,bsd->btd"}> : () -> ()
    %cst_40 = arith.constant dense<0.000000e+00> : vector<2x8x8xf32>
    %133 = tpu.matmul %132, %117, %cst_40 {dimension_numbers = #tpu.dot_dimension_numbers<[2], [1], [1], [2], [0, 0, 0, 1, 1, 2], [0], [0]>} : vector<2x8x8xf32>, vector<2x8x8xf32>, vector<2x8x8xf32> -> vector<2x8x8xf32>
    "tpu.trace_stop"() : () -> ()
    %134 = tpu.concatenate %76, %95, %114, %133 in 2 : vector<2x8x8xf32>, vector<2x8x8xf32>, vector<2x8x8xf32>, vector<2x8x8xf32> -> vector<2x8x32xf32>
    %135 = vector.shape_cast %134 : vector<2x8x32xf32> to vector<16x32xf32>
    %c0_41 = arith.constant 0 : index
    %c0_42 = arith.constant 0 : index
    %c0_43 = arith.constant 0 : index
    %136 = vector.load %arg4[%c0_41, %c0_42, %c0_43] : memref<2x32x32xf32, #tpu.memory_space<vmem>>, vector<1x32x32xf32>
    %137 = vector.shape_cast %136 : vector<1x32x32xf32> to vector<32x32xf32>
    %cst_44 = arith.constant dense<0.000000e+00> : vector<16x32xf32>
    %138 = tpu.matmul %135, %137, %cst_44 {dimension_numbers = #tpu.dot_dimension_numbers<[1], [0], [0], [1], [0, 0, 1, 1], [], []>} : vector<16x32xf32>, vector<32x32xf32>, vector<16x32xf32> -> vector<16x32xf32>
    %139 = arith.addf %6, %138 : vector<16x32xf32>
    %140 = vector.broadcast %21 : vector<1x32xf32> to vector<16x32xf32>
    %141 = arith.addf %139, %140 : vector<16x32xf32>
    %142 = vector.extract_strided_slice %16 {offsets = [0, 0], sizes = [1, 32], strides = [1, 1]} : vector<2x32xf32> to vector<1x32xf32>
    %143 = vector.extract_strided_slice %16 {offsets = [1, 0], sizes = [1, 32], strides = [1, 1]} : vector<2x32xf32> to vector<1x32xf32>
    %cst_45 = arith.constant dense<0.000000e+00> : vector<16xf32>
    %144 = vector.multi_reduction <add>, %141, %cst_45 [1] : vector<16x32xf32> to vector<16xf32>
    %145 = vector.shape_cast %144 : vector<16xf32> to vector<16x1xf32>
    %cst_46 = arith.constant 3.200000e+01 : f32
    %146 = vector.broadcast %cst_46 : f32 to vector<16x1xf32>
    %147 = arith.divf %145, %146 : vector<16x1xf32>
    %148 = vector.broadcast %147 : vector<16x1xf32> to vector<16x32xf32>
    %149 = arith.subf %141, %148 : vector<16x32xf32>
    %150 = arith.mulf %149, %149 : vector<16x32xf32>
    %cst_47 = arith.constant dense<0.000000e+00> : vector<16xf32>
    %151 = vector.multi_reduction <add>, %150, %cst_47 [1] : vector<16x32xf32> to vector<16xf32>
    %152 = vector.shape_cast %151 : vector<16xf32> to vector<16x1xf32>
    %cst_48 = arith.constant 3.200000e+01 : f32
    %153 = vector.broadcast %cst_48 : f32 to vector<16x1xf32>
    %154 = arith.divf %152, %153 : vector<16x1xf32>
    %155 = vector.broadcast %147 : vector<16x1xf32> to vector<16x32xf32>
    %156 = arith.subf %141, %155 : vector<16x32xf32>
    %cst_49 = arith.constant 9.99999974E-6 : f32
    %157 = vector.broadcast %cst_49 : f32 to vector<16x1xf32>
    %158 = arith.addf %154, %157 : vector<16x1xf32>
    %159 = math.rsqrt %158 : vector<16x1xf32>
    %160 = vector.broadcast %159 : vector<16x1xf32> to vector<16x32xf32>
    %161 = arith.mulf %156, %160 : vector<16x32xf32>
    %162 = vector.broadcast %142 : vector<1x32xf32> to vector<16x32xf32>
    %163 = arith.mulf %161, %162 : vector<16x32xf32>
    %164 = vector.broadcast %143 : vector<1x32xf32> to vector<16x32xf32>
    %165 = arith.addf %163, %164 : vector<16x32xf32>
    %c0_50 = arith.constant 0 : index
    %c0_51 = arith.constant 0 : index
    %c0_52 = arith.constant 0 : index
    %166 = vector.load %arg5[%c0_50, %c0_51, %c0_52] : memref<2x32x128xf32, #tpu.memory_space<vmem>>, vector<1x32x128xf32>
    %167 = vector.shape_cast %166 : vector<1x32x128xf32> to vector<32x128xf32>
    %cst_53 = arith.constant dense<0.000000e+00> : vector<16x128xf32>
    %168 = tpu.matmul %165, %167, %cst_53 {dimension_numbers = #tpu.dot_dimension_numbers<[1], [0], [0], [1], [0, 0, 1, 1], [], []>} : vector<16x32xf32>, vector<32x128xf32>, vector<16x128xf32> -> vector<16x128xf32>
    %169 = vector.broadcast %20 : vector<1x128xf32> to vector<16x128xf32>
    %170 = arith.addf %168, %169 : vector<16x128xf32>
    %cst_54 = arith.constant 5.000000e-01 : f32
    %171 = vector.broadcast %cst_54 : f32 to vector<16x128xf32>
    %172 = arith.mulf %171, %170 : vector<16x128xf32>
    %cst_55 = arith.constant 4.471500e-02 : f32
    %173 = vector.broadcast %cst_55 : f32 to vector<16x128xf32>
    %174 = arith.mulf %173, %170 : vector<16x128xf32>
    %175 = arith.mulf %174, %170 : vector<16x128xf32>
    %176 = arith.mulf %175, %170 : vector<16x128xf32>
    %177 = arith.addf %170, %176 : vector<16x128xf32>
    %cst_56 = arith.constant 0.797884583 : f32
    %178 = vector.broadcast %cst_56 : f32 to vector<16x128xf32>
    %179 = arith.mulf %178, %177 : vector<16x128xf32>
    %180 = math.tanh %179 : vector<16x128xf32>
    %cst_57 = arith.constant 1.000000e+00 : f32
    %181 = vector.broadcast %cst_57 : f32 to vector<16x128xf32>
    %182 = arith.addf %181, %180 : vector<16x128xf32>
    %183 = arith.mulf %172, %182 : vector<16x128xf32>
    %c0_58 = arith.constant 0 : index
    %c0_59 = arith.constant 0 : index
    %c0_60 = arith.constant 0 : index
    %184 = vector.load %arg6[%c0_58, %c0_59, %c0_60] : memref<2x128x32xf32, #tpu.memory_space<vmem>>, vector<1x128x32xf32>
    %185 = vector.shape_cast %184 : vector<1x128x32xf32> to vector<128x32xf32>
    %cst_61 = arith.constant dense<0.000000e+00> : vector<16x32xf32>
    %186 = tpu.matmul %183, %185, %cst_61 {dimension_numbers = #tpu.dot_dimension_numbers<[1], [0], [0], [1], [0, 0, 1, 1], [], []>} : vector<16x128xf32>, vector<128x32xf32>, vector<16x32xf32> -> vector<16x32xf32>
    %187 = arith.addf %141, %186 : vector<16x32xf32>
    %188 = vector.broadcast %22 : vector<1x32xf32> to vector<16x32xf32>
    %189 = arith.addf %187, %188 : vector<16x32xf32>
    %c2 = arith.constant 2 : index
    %c0_62 = arith.constant 0 : index
    %c0_63 = arith.constant 0 : index
    %190 = vector.load %arg2[%c2, %c0_62, %c0_63] : memref<5x2x32xf32, #tpu.memory_space<vmem>>, vector<1x2x32xf32>
    %191 = vector.shape_cast %190 : vector<1x2x32xf32> to vector<2x32xf32>
    %c3 = arith.constant 3 : index
    %c0_64 = arith.constant 0 : index
    %c0_65 = arith.constant 0 : index
    %192 = vector.load %arg2[%c3, %c0_64, %c0_65] : memref<5x2x32xf32, #tpu.memory_space<vmem>>, vector<1x2x32xf32>
    %193 = vector.shape_cast %192 : vector<1x2x32xf32> to vector<2x32xf32>
    %c1_66 = arith.constant 1 : index
    %c0_67 = arith.constant 0 : index
    %c0_68 = arith.constant 0 : index
    %194 = vector.load %arg7[%c1_66, %c0_67, %c0_68] : memref<2x3x128xf32, #tpu.memory_space<vmem>>, vector<1x3x128xf32>
    %195 = vector.shape_cast %194 : vector<1x3x128xf32> to vector<3x128xf32>
    %196 = vector.extract_strided_slice %195 {offsets = [0, 0], sizes = [1, 96], strides = [1, 1]} : vector<3x128xf32> to vector<1x96xf32>
    %197 = vector.extract_strided_slice %195 {offsets = [1, 0], sizes = [1, 128], strides = [1, 1]} : vector<3x128xf32> to vector<1x128xf32>
    %198 = vector.extract_strided_slice %195 {offsets = [2, 0], sizes = [1, 32], strides = [1, 1]} : vector<3x128xf32> to vector<1x32xf32>
    %199 = vector.extract_strided_slice %195 {offsets = [2, 32], sizes = [1, 32], strides = [1, 1]} : vector<3x128xf32> to vector<1x32xf32>
    %200 = vector.extract_strided_slice %191 {offsets = [0, 0], sizes = [1, 32], strides = [1, 1]} : vector<2x32xf32> to vector<1x32xf32>
    %201 = vector.extract_strided_slice %191 {offsets = [1, 0], sizes = [1, 32], strides = [1, 1]} : vector<2x32xf32> to vector<1x32xf32>
    %cst_69 = arith.constant dense<0.000000e+00> : vector<16xf32>
    %202 = vector.multi_reduction <add>, %189, %cst_69 [1] : vector<16x32xf32> to vector<16xf32>
    %203 = vector.shape_cast %202 : vector<16xf32> to vector<16x1xf32>
    %cst_70 = arith.constant 3.200000e+01 : f32
    %204 = vector.broadcast %cst_70 : f32 to vector<16x1xf32>
    %205 = arith.divf %203, %204 : vector<16x1xf32>
    %206 = vector.broadcast %205 : vector<16x1xf32> to vector<16x32xf32>
    %207 = arith.subf %189, %206 : vector<16x32xf32>
    %208 = arith.mulf %207, %207 : vector<16x32xf32>
    %cst_71 = arith.constant dense<0.000000e+00> : vector<16xf32>
    %209 = vector.multi_reduction <add>, %208, %cst_71 [1] : vector<16x32xf32> to vector<16xf32>
    %210 = vector.shape_cast %209 : vector<16xf32> to vector<16x1xf32>
    %cst_72 = arith.constant 3.200000e+01 : f32
    %211 = vector.broadcast %cst_72 : f32 to vector<16x1xf32>
    %212 = arith.divf %210, %211 : vector<16x1xf32>
    %213 = vector.broadcast %205 : vector<16x1xf32> to vector<16x32xf32>
    %214 = arith.subf %189, %213 : vector<16x32xf32>
    %cst_73 = arith.constant 9.99999974E-6 : f32
    %215 = vector.broadcast %cst_73 : f32 to vector<16x1xf32>
    %216 = arith.addf %212, %215 : vector<16x1xf32>
    %217 = math.rsqrt %216 : vector<16x1xf32>
    %218 = vector.broadcast %217 : vector<16x1xf32> to vector<16x32xf32>
    %219 = arith.mulf %214, %218 : vector<16x32xf32>
    %220 = vector.broadcast %200 : vector<1x32xf32> to vector<16x32xf32>
    %221 = arith.mulf %219, %220 : vector<16x32xf32>
    %222 = vector.broadcast %201 : vector<1x32xf32> to vector<16x32xf32>
    %223 = arith.addf %221, %222 : vector<16x32xf32>
    %c1_74 = arith.constant 1 : index
    %c0_75 = arith.constant 0 : index
    %c0_76 = arith.constant 0 : index
    %224 = vector.load %arg3[%c1_74, %c0_75, %c0_76] : memref<2x32x96xf32, #tpu.memory_space<vmem>>, vector<1x32x96xf32>
    %225 = vector.shape_cast %224 : vector<1x32x96xf32> to vector<32x96xf32>
    %cst_77 = arith.constant dense<0.000000e+00> : vector<16x96xf32>
    %226 = tpu.matmul %223, %225, %cst_77 {dimension_numbers = #tpu.dot_dimension_numbers<[1], [0], [0], [1], [0, 0, 1, 1], [], []>} : vector<16x32xf32>, vector<32x96xf32>, vector<16x96xf32> -> vector<16x96xf32>
    %227 = vector.broadcast %196 : vector<1x96xf32> to vector<16x96xf32>
    %228 = arith.addf %226, %227 : vector<16x96xf32>
    %229 = vector.extract_strided_slice %228 {offsets = [0, 0], sizes = [16, 32], strides = [1, 1]} : vector<16x96xf32> to vector<16x32xf32>
    %230 = vector.shape_cast %229 : vector<16x32xf32> to vector<2x8x32xf32>
    %231 = vector.extract_strided_slice %228 {offsets = [0, 32], sizes = [16, 32], strides = [1, 1]} : vector<16x96xf32> to vector<16x32xf32>
    %232 = vector.shape_cast %231 : vector<16x32xf32> to vector<2x8x32xf32>
    %233 = vector.extract_strided_slice %228 {offsets = [0, 64], sizes = [16, 32], strides = [1, 1]} : vector<16x96xf32> to vector<16x32xf32>
    %234 = vector.shape_cast %233 : vector<16x32xf32> to vector<2x8x32xf32>
    %235 = vector.extract_strided_slice %230 {offsets = [0, 0, 0], sizes = [2, 8, 8], strides = [1, 1, 1]} : vector<2x8x32xf32> to vector<2x8x8xf32>
    %236 = vector.extract_strided_slice %232 {offsets = [0, 0, 0], sizes = [2, 8, 8], strides = [1, 1, 1]} : vector<2x8x32xf32> to vector<2x8x8xf32>
    %237 = vector.extract_strided_slice %234 {offsets = [0, 0, 0], sizes = [2, 8, 8], strides = [1, 1, 1]} : vector<2x8x32xf32> to vector<2x8x8xf32>
    "tpu.trace_start"() <{level = 10 : i32, message = "btd,bsd->bts"}> : () -> ()
    %cst_78 = arith.constant dense<0.000000e+00> : vector<2x8x8xf32>
    %238 = tpu.matmul %235, %236, %cst_78 {dimension_numbers = #tpu.dot_dimension_numbers<[2], [2], [1], [1], [0, 0, 0, 1, 1, 1], [0], [0]>} : vector<2x8x8xf32>, vector<2x8x8xf32>, vector<2x8x8xf32> -> vector<2x8x8xf32>
    "tpu.trace_stop"() : () -> ()
    %cst_79 = arith.constant 0.353553385 : f32
    %239 = vector.broadcast %cst_79 : f32 to vector<2x8x8xf32>
    %240 = arith.mulf %238, %239 : vector<2x8x8xf32>
    %241 = vector.shape_cast %12 : vector<8x8xf32> to vector<1x8x8xf32>
    %242 = vector.broadcast %241 : vector<1x8x8xf32> to vector<2x8x8xf32>
    %243 = arith.addf %240, %242 : vector<2x8x8xf32>
    %cst_80 = arith.constant dense<0xFF800000> : vector<2x8xf32>
    %244 = vector.multi_reduction <maximumf>, %243, %cst_80 [2] : vector<2x8x8xf32> to vector<2x8xf32>
    %245 = vector.shape_cast %244 : vector<2x8xf32> to vector<2x8x1xf32>
    %246 = vector.broadcast %245 : vector<2x8x1xf32> to vector<2x8x8xf32>
    %247 = arith.subf %243, %246 : vector<2x8x8xf32>
    %248 = math.exp %247 : vector<2x8x8xf32>
    %cst_81 = arith.constant dense<0.000000e+00> : vector<2x8xf32>
    %249 = vector.multi_reduction <add>, %248, %cst_81 [2] : vector<2x8x8xf32> to vector<2x8xf32>
    %250 = vector.shape_cast %249 : vector<2x8xf32> to vector<2x8x1xf32>
    %251 = vector.broadcast %250 : vector<2x8x1xf32> to vector<2x8x8xf32>
    %252 = arith.divf %248, %251 : vector<2x8x8xf32>
    "tpu.trace_start"() <{level = 10 : i32, message = "bts,bsd->btd"}> : () -> ()
    %cst_82 = arith.constant dense<0.000000e+00> : vector<2x8x8xf32>
    %253 = tpu.matmul %252, %237, %cst_82 {dimension_numbers = #tpu.dot_dimension_numbers<[2], [1], [1], [2], [0, 0, 0, 1, 1, 2], [0], [0]>} : vector<2x8x8xf32>, vector<2x8x8xf32>, vector<2x8x8xf32> -> vector<2x8x8xf32>
    "tpu.trace_stop"() : () -> ()
    %254 = vector.extract_strided_slice %230 {offsets = [0, 0, 8], sizes = [2, 8, 8], strides = [1, 1, 1]} : vector<2x8x32xf32> to vector<2x8x8xf32>
    %255 = vector.extract_strided_slice %232 {offsets = [0, 0, 8], sizes = [2, 8, 8], strides = [1, 1, 1]} : vector<2x8x32xf32> to vector<2x8x8xf32>
    %256 = vector.extract_strided_slice %234 {offsets = [0, 0, 8], sizes = [2, 8, 8], strides = [1, 1, 1]} : vector<2x8x32xf32> to vector<2x8x8xf32>
    "tpu.trace_start"() <{level = 10 : i32, message = "btd,bsd->bts"}> : () -> ()
    %cst_83 = arith.constant dense<0.000000e+00> : vector<2x8x8xf32>
    %257 = tpu.matmul %254, %255, %cst_83 {dimension_numbers = #tpu.dot_dimension_numbers<[2], [2], [1], [1], [0, 0, 0, 1, 1, 1], [0], [0]>} : vector<2x8x8xf32>, vector<2x8x8xf32>, vector<2x8x8xf32> -> vector<2x8x8xf32>
    "tpu.trace_stop"() : () -> ()
    %cst_84 = arith.constant 0.353553385 : f32
    %258 = vector.broadcast %cst_84 : f32 to vector<2x8x8xf32>
    %259 = arith.mulf %257, %258 : vector<2x8x8xf32>
    %260 = vector.shape_cast %12 : vector<8x8xf32> to vector<1x8x8xf32>
    %261 = vector.broadcast %260 : vector<1x8x8xf32> to vector<2x8x8xf32>
    %262 = arith.addf %259, %261 : vector<2x8x8xf32>
    %cst_85 = arith.constant dense<0xFF800000> : vector<2x8xf32>
    %263 = vector.multi_reduction <maximumf>, %262, %cst_85 [2] : vector<2x8x8xf32> to vector<2x8xf32>
    %264 = vector.shape_cast %263 : vector<2x8xf32> to vector<2x8x1xf32>
    %265 = vector.broadcast %264 : vector<2x8x1xf32> to vector<2x8x8xf32>
    %266 = arith.subf %262, %265 : vector<2x8x8xf32>
    %267 = math.exp %266 : vector<2x8x8xf32>
    %cst_86 = arith.constant dense<0.000000e+00> : vector<2x8xf32>
    %268 = vector.multi_reduction <add>, %267, %cst_86 [2] : vector<2x8x8xf32> to vector<2x8xf32>
    %269 = vector.shape_cast %268 : vector<2x8xf32> to vector<2x8x1xf32>
    %270 = vector.broadcast %269 : vector<2x8x1xf32> to vector<2x8x8xf32>
    %271 = arith.divf %267, %270 : vector<2x8x8xf32>
    "tpu.trace_start"() <{level = 10 : i32, message = "bts,bsd->btd"}> : () -> ()
    %cst_87 = arith.constant dense<0.000000e+00> : vector<2x8x8xf32>
    %272 = tpu.matmul %271, %256, %cst_87 {dimension_numbers = #tpu.dot_dimension_numbers<[2], [1], [1], [2], [0, 0, 0, 1, 1, 2], [0], [0]>} : vector<2x8x8xf32>, vector<2x8x8xf32>, vector<2x8x8xf32> -> vector<2x8x8xf32>
    "tpu.trace_stop"() : () -> ()
    %273 = vector.extract_strided_slice %230 {offsets = [0, 0, 16], sizes = [2, 8, 8], strides = [1, 1, 1]} : vector<2x8x32xf32> to vector<2x8x8xf32>
    %274 = vector.extract_strided_slice %232 {offsets = [0, 0, 16], sizes = [2, 8, 8], strides = [1, 1, 1]} : vector<2x8x32xf32> to vector<2x8x8xf32>
    %275 = vector.extract_strided_slice %234 {offsets = [0, 0, 16], sizes = [2, 8, 8], strides = [1, 1, 1]} : vector<2x8x32xf32> to vector<2x8x8xf32>
    "tpu.trace_start"() <{level = 10 : i32, message = "btd,bsd->bts"}> : () -> ()
    %cst_88 = arith.constant dense<0.000000e+00> : vector<2x8x8xf32>
    %276 = tpu.matmul %273, %274, %cst_88 {dimension_numbers = #tpu.dot_dimension_numbers<[2], [2], [1], [1], [0, 0, 0, 1, 1, 1], [0], [0]>} : vector<2x8x8xf32>, vector<2x8x8xf32>, vector<2x8x8xf32> -> vector<2x8x8xf32>
    "tpu.trace_stop"() : () -> ()
    %cst_89 = arith.constant 0.353553385 : f32
    %277 = vector.broadcast %cst_89 : f32 to vector<2x8x8xf32>
    %278 = arith.mulf %276, %277 : vector<2x8x8xf32>
    %279 = vector.shape_cast %12 : vector<8x8xf32> to vector<1x8x8xf32>
    %280 = vector.broadcast %279 : vector<1x8x8xf32> to vector<2x8x8xf32>
    %281 = arith.addf %278, %280 : vector<2x8x8xf32>
    %cst_90 = arith.constant dense<0xFF800000> : vector<2x8xf32>
    %282 = vector.multi_reduction <maximumf>, %281, %cst_90 [2] : vector<2x8x8xf32> to vector<2x8xf32>
    %283 = vector.shape_cast %282 : vector<2x8xf32> to vector<2x8x1xf32>
    %284 = vector.broadcast %283 : vector<2x8x1xf32> to vector<2x8x8xf32>
    %285 = arith.subf %281, %284 : vector<2x8x8xf32>
    %286 = math.exp %285 : vector<2x8x8xf32>
    %cst_91 = arith.constant dense<0.000000e+00> : vector<2x8xf32>
    %287 = vector.multi_reduction <add>, %286, %cst_91 [2] : vector<2x8x8xf32> to vector<2x8xf32>
    %288 = vector.shape_cast %287 : vector<2x8xf32> to vector<2x8x1xf32>
    %289 = vector.broadcast %288 : vector<2x8x1xf32> to vector<2x8x8xf32>
    %290 = arith.divf %286, %289 : vector<2x8x8xf32>
    "tpu.trace_start"() <{level = 10 : i32, message = "bts,bsd->btd"}> : () -> ()
    %cst_92 = arith.constant dense<0.000000e+00> : vector<2x8x8xf32>
    %291 = tpu.matmul %290, %275, %cst_92 {dimension_numbers = #tpu.dot_dimension_numbers<[2], [1], [1], [2], [0, 0, 0, 1, 1, 2], [0], [0]>} : vector<2x8x8xf32>, vector<2x8x8xf32>, vector<2x8x8xf32> -> vector<2x8x8xf32>
    "tpu.trace_stop"() : () -> ()
    %292 = vector.extract_strided_slice %230 {offsets = [0, 0, 24], sizes = [2, 8, 8], strides = [1, 1, 1]} : vector<2x8x32xf32> to vector<2x8x8xf32>
    %293 = vector.extract_strided_slice %232 {offsets = [0, 0, 24], sizes = [2, 8, 8], strides = [1, 1, 1]} : vector<2x8x32xf32> to vector<2x8x8xf32>
    %294 = vector.extract_strided_slice %234 {offsets = [0, 0, 24], sizes = [2, 8, 8], strides = [1, 1, 1]} : vector<2x8x32xf32> to vector<2x8x8xf32>
    "tpu.trace_start"() <{level = 10 : i32, message = "btd,bsd->bts"}> : () -> ()
    %cst_93 = arith.constant dense<0.000000e+00> : vector<2x8x8xf32>
    %295 = tpu.matmul %292, %293, %cst_93 {dimension_numbers = #tpu.dot_dimension_numbers<[2], [2], [1], [1], [0, 0, 0, 1, 1, 1], [0], [0]>} : vector<2x8x8xf32>, vector<2x8x8xf32>, vector<2x8x8xf32> -> vector<2x8x8xf32>
    "tpu.trace_stop"() : () -> ()
    %cst_94 = arith.constant 0.353553385 : f32
    %296 = vector.broadcast %cst_94 : f32 to vector<2x8x8xf32>
    %297 = arith.mulf %295, %296 : vector<2x8x8xf32>
    %298 = vector.shape_cast %12 : vector<8x8xf32> to vector<1x8x8xf32>
    %299 = vector.broadcast %298 : vector<1x8x8xf32> to vector<2x8x8xf32>
    %300 = arith.addf %297, %299 : vector<2x8x8xf32>
    %cst_95 = arith.constant dense<0xFF800000> : vector<2x8xf32>
    %301 = vector.multi_reduction <maximumf>, %300, %cst_95 [2] : vector<2x8x8xf32> to vector<2x8xf32>
    %302 = vector.shape_cast %301 : vector<2x8xf32> to vector<2x8x1xf32>
    %303 = vector.broadcast %302 : vector<2x8x1xf32> to vector<2x8x8xf32>
    %304 = arith.subf %300, %303 : vector<2x8x8xf32>
    %305 = math.exp %304 : vector<2x8x8xf32>
    %cst_96 = arith.constant dense<0.000000e+00> : vector<2x8xf32>
    %306 = vector.multi_reduction <add>, %305, %cst_96 [2] : vector<2x8x8xf32> to vector<2x8xf32>
    %307 = vector.shape_cast %306 : vector<2x8xf32> to vector<2x8x1xf32>
    %308 = vector.broadcast %307 : vector<2x8x1xf32> to vector<2x8x8xf32>
    %309 = arith.divf %305, %308 : vector<2x8x8xf32>
    "tpu.trace_start"() <{level = 10 : i32, message = "bts,bsd->btd"}> : () -> ()
    %cst_97 = arith.constant dense<0.000000e+00> : vector<2x8x8xf32>
    %310 = tpu.matmul %309, %294, %cst_97 {dimension_numbers = #tpu.dot_dimension_numbers<[2], [1], [1], [2], [0, 0, 0, 1, 1, 2], [0], [0]>} : vector<2x8x8xf32>, vector<2x8x8xf32>, vector<2x8x8xf32> -> vector<2x8x8xf32>
    "tpu.trace_stop"() : () -> ()
    %311 = tpu.concatenate %253, %272, %291, %310 in 2 : vector<2x8x8xf32>, vector<2x8x8xf32>, vector<2x8x8xf32>, vector<2x8x8xf32> -> vector<2x8x32xf32>
    %312 = vector.shape_cast %311 : vector<2x8x32xf32> to vector<16x32xf32>
    %c1_98 = arith.constant 1 : index
    %c0_99 = arith.constant 0 : index
    %c0_100 = arith.constant 0 : index
    %313 = vector.load %arg4[%c1_98, %c0_99, %c0_100] : memref<2x32x32xf32, #tpu.memory_space<vmem>>, vector<1x32x32xf32>
    %314 = vector.shape_cast %313 : vector<1x32x32xf32> to vector<32x32xf32>
    %cst_101 = arith.constant dense<0.000000e+00> : vector<16x32xf32>
    %315 = tpu.matmul %312, %314, %cst_101 {dimension_numbers = #tpu.dot_dimension_numbers<[1], [0], [0], [1], [0, 0, 1, 1], [], []>} : vector<16x32xf32>, vector<32x32xf32>, vector<16x32xf32> -> vector<16x32xf32>
    %316 = arith.addf %189, %315 : vector<16x32xf32>
    %317 = vector.broadcast %198 : vector<1x32xf32> to vector<16x32xf32>
    %318 = arith.addf %316, %317 : vector<16x32xf32>
    %319 = vector.extract_strided_slice %193 {offsets = [0, 0], sizes = [1, 32], strides = [1, 1]} : vector<2x32xf32> to vector<1x32xf32>
    %320 = vector.extract_strided_slice %193 {offsets = [1, 0], sizes = [1, 32], strides = [1, 1]} : vector<2x32xf32> to vector<1x32xf32>
    %cst_102 = arith.constant dense<0.000000e+00> : vector<16xf32>
    %321 = vector.multi_reduction <add>, %318, %cst_102 [1] : vector<16x32xf32> to vector<16xf32>
    %322 = vector.shape_cast %321 : vector<16xf32> to vector<16x1xf32>
    %cst_103 = arith.constant 3.200000e+01 : f32
    %323 = vector.broadcast %cst_103 : f32 to vector<16x1xf32>
    %324 = arith.divf %322, %323 : vector<16x1xf32>
    %325 = vector.broadcast %324 : vector<16x1xf32> to vector<16x32xf32>
    %326 = arith.subf %318, %325 : vector<16x32xf32>
    %327 = arith.mulf %326, %326 : vector<16x32xf32>
    %cst_104 = arith.constant dense<0.000000e+00> : vector<16xf32>
    %328 = vector.multi_reduction <add>, %327, %cst_104 [1] : vector<16x32xf32> to vector<16xf32>
    %329 = vector.shape_cast %328 : vector<16xf32> to vector<16x1xf32>
    %cst_105 = arith.constant 3.200000e+01 : f32
    %330 = vector.broadcast %cst_105 : f32 to vector<16x1xf32>
    %331 = arith.divf %329, %330 : vector<16x1xf32>
    %332 = vector.broadcast %324 : vector<16x1xf32> to vector<16x32xf32>
    %333 = arith.subf %318, %332 : vector<16x32xf32>
    %cst_106 = arith.constant 9.99999974E-6 : f32
    %334 = vector.broadcast %cst_106 : f32 to vector<16x1xf32>
    %335 = arith.addf %331, %334 : vector<16x1xf32>
    %336 = math.rsqrt %335 : vector<16x1xf32>
    %337 = vector.broadcast %336 : vector<16x1xf32> to vector<16x32xf32>
    %338 = arith.mulf %333, %337 : vector<16x32xf32>
    %339 = vector.broadcast %319 : vector<1x32xf32> to vector<16x32xf32>
    %340 = arith.mulf %338, %339 : vector<16x32xf32>
    %341 = vector.broadcast %320 : vector<1x32xf32> to vector<16x32xf32>
    %342 = arith.addf %340, %341 : vector<16x32xf32>
    %c1_107 = arith.constant 1 : index
    %c0_108 = arith.constant 0 : index
    %c0_109 = arith.constant 0 : index
    %343 = vector.load %arg5[%c1_107, %c0_108, %c0_109] : memref<2x32x128xf32, #tpu.memory_space<vmem>>, vector<1x32x128xf32>
    %344 = vector.shape_cast %343 : vector<1x32x128xf32> to vector<32x128xf32>
    %cst_110 = arith.constant dense<0.000000e+00> : vector<16x128xf32>
    %345 = tpu.matmul %342, %344, %cst_110 {dimension_numbers = #tpu.dot_dimension_numbers<[1], [0], [0], [1], [0, 0, 1, 1], [], []>} : vector<16x32xf32>, vector<32x128xf32>, vector<16x128xf32> -> vector<16x128xf32>
    %346 = vector.broadcast %197 : vector<1x128xf32> to vector<16x128xf32>
    %347 = arith.addf %345, %346 : vector<16x128xf32>
    %cst_111 = arith.constant 5.000000e-01 : f32
    %348 = vector.broadcast %cst_111 : f32 to vector<16x128xf32>
    %349 = arith.mulf %348, %347 : vector<16x128xf32>
    %cst_112 = arith.constant 4.471500e-02 : f32
    %350 = vector.broadcast %cst_112 : f32 to vector<16x128xf32>
    %351 = arith.mulf %350, %347 : vector<16x128xf32>
    %352 = arith.mulf %351, %347 : vector<16x128xf32>
    %353 = arith.mulf %352, %347 : vector<16x128xf32>
    %354 = arith.addf %347, %353 : vector<16x128xf32>
    %cst_113 = arith.constant 0.797884583 : f32
    %355 = vector.broadcast %cst_113 : f32 to vector<16x128xf32>
    %356 = arith.mulf %355, %354 : vector<16x128xf32>
    %357 = math.tanh %356 : vector<16x128xf32>
    %cst_114 = arith.constant 1.000000e+00 : f32
    %358 = vector.broadcast %cst_114 : f32 to vector<16x128xf32>
    %359 = arith.addf %358, %357 : vector<16x128xf32>
    %360 = arith.mulf %349, %359 : vector<16x128xf32>
    %c1_115 = arith.constant 1 : index
    %c0_116 = arith.constant 0 : index
    %c0_117 = arith.constant 0 : index
    %361 = vector.load %arg6[%c1_115, %c0_116, %c0_117] : memref<2x128x32xf32, #tpu.memory_space<vmem>>, vector<1x128x32xf32>
    %362 = vector.shape_cast %361 : vector<1x128x32xf32> to vector<128x32xf32>
    %cst_118 = arith.constant dense<0.000000e+00> : vector<16x32xf32>
    %363 = tpu.matmul %360, %362, %cst_118 {dimension_numbers = #tpu.dot_dimension_numbers<[1], [0], [0], [1], [0, 0, 1, 1], [], []>} : vector<16x128xf32>, vector<128x32xf32>, vector<16x32xf32> -> vector<16x32xf32>
    %364 = arith.addf %318, %363 : vector<16x32xf32>
    %365 = vector.broadcast %199 : vector<1x32xf32> to vector<16x32xf32>
    %366 = arith.addf %364, %365 : vector<16x32xf32>
    %c4 = arith.constant 4 : index
    %c0_119 = arith.constant 0 : index
    %c0_120 = arith.constant 0 : index
    %367 = vector.load %arg2[%c4, %c0_119, %c0_120] : memref<5x2x32xf32, #tpu.memory_space<vmem>>, vector<1x2x32xf32>
    %368 = vector.shape_cast %367 : vector<1x2x32xf32> to vector<2x32xf32>
    %369 = vector.extract_strided_slice %368 {offsets = [0, 0], sizes = [1, 32], strides = [1, 1]} : vector<2x32xf32> to vector<1x32xf32>
    %370 = vector.extract_strided_slice %368 {offsets = [1, 0], sizes = [1, 32], strides = [1, 1]} : vector<2x32xf32> to vector<1x32xf32>
    %cst_121 = arith.constant dense<0.000000e+00> : vector<16xf32>
    %371 = vector.multi_reduction <add>, %366, %cst_121 [1] : vector<16x32xf32> to vector<16xf32>
    %372 = vector.shape_cast %371 : vector<16xf32> to vector<16x1xf32>
    %cst_122 = arith.constant 3.200000e+01 : f32
    %373 = vector.broadcast %cst_122 : f32 to vector<16x1xf32>
    %374 = arith.divf %372, %373 : vector<16x1xf32>
    %375 = vector.broadcast %374 : vector<16x1xf32> to vector<16x32xf32>
    %376 = arith.subf %366, %375 : vector<16x32xf32>
    %377 = arith.mulf %376, %376 : vector<16x32xf32>
    %cst_123 = arith.constant dense<0.000000e+00> : vector<16xf32>
    %378 = vector.multi_reduction <add>, %377, %cst_123 [1] : vector<16x32xf32> to vector<16xf32>
    %379 = vector.shape_cast %378 : vector<16xf32> to vector<16x1xf32>
    %cst_124 = arith.constant 3.200000e+01 : f32
    %380 = vector.broadcast %cst_124 : f32 to vector<16x1xf32>
    %381 = arith.divf %379, %380 : vector<16x1xf32>
    %382 = vector.broadcast %374 : vector<16x1xf32> to vector<16x32xf32>
    %383 = arith.subf %366, %382 : vector<16x32xf32>
    %cst_125 = arith.constant 9.99999974E-6 : f32
    %384 = vector.broadcast %cst_125 : f32 to vector<16x1xf32>
    %385 = arith.addf %381, %384 : vector<16x1xf32>
    %386 = math.rsqrt %385 : vector<16x1xf32>
    %387 = vector.broadcast %386 : vector<16x1xf32> to vector<16x32xf32>
    %388 = arith.mulf %383, %387 : vector<16x32xf32>
    %389 = vector.broadcast %369 : vector<1x32xf32> to vector<16x32xf32>
    %390 = arith.mulf %388, %389 : vector<16x32xf32>
    %391 = vector.broadcast %370 : vector<1x32xf32> to vector<16x32xf32>
    %392 = arith.addf %390, %391 : vector<16x32xf32>
    %c0_126 = arith.constant 0 : index
    %c0_127 = arith.constant 0 : index
    %393 = vector.load %arg8[%c0_126, %c0_127] : memref<32x128xf32, #tpu.memory_space<vmem>>, vector<32x128xf32>
    %cst_128 = arith.constant dense<0.000000e+00> : vector<16x128xf32>
    %394 = tpu.matmul %392, %393, %cst_128 {dimension_numbers = #tpu.dot_dimension_numbers<[1], [0], [0], [1], [0, 0, 1, 1], [], []>} : vector<16x32xf32>, vector<32x128xf32>, vector<16x128xf32> -> vector<16x128xf32>
    %c0_129 = arith.constant 0 : index
    %c0_130 = arith.constant 0 : index
    %395 = vector.load %arg9[%c0_129, %c0_130] : memref<16x128xf32, #tpu.memory_space<vmem>>, vector<16x128xf32>
    tpu.vector_store %arg9[%c0_129, %c0_130], %394 {strides = array<i32>} : memref<16x128xf32, #tpu.memory_space<vmem>>, vector<16x128xf32>,
    return
  }
}

</mosaic_0001>

<bundles_post_ra>
// kernel: tpu_custom_call.1
= control target key start
LH: loop header
LB: loop body
LE: loop exit
PB: predicated region body
PF: predicated region fallthrough
CT: control target
= control target key end

     0   :  { %vm48_vm0 = vcmask 261120   ;;  %s5409_s0 = inlined_call_operand.vmem [shape: f32[16,32], index: 0, kind: input, shape index: {}]   ;;  %s5410_s1 = inlined_call_operand.vmem [shape: f32[8,32], index: 1, kind: input, shape index: {}]   ;;  %s5411_s2 = inlined_call_operand.vmem [shape: f32[5,2,32], index: 2, kind: input, shape index: {}]   ;;  %s5412_s3 = inlined_call_operand.vmem [shape: f32[2,32,96], index: 3, kind: input, shape index: {}]   ;;  %s5413_s4 = inlined_call_operand.vmem [shape: f32[2,32,32], index: 4, kind: input, shape index: {}]   ;;  %s5414_s5 = inlined_call_operand.vmem [shape: f32[2,32,128], index: 5, kind: input, shape index: {}]   ;;  %s5415_s6 = inlined_call_operand.vmem [shape: f32[2,128,32], index: 6, kind: input, shape index: {}]   ;;  %s5416_s7 = inlined_call_operand.vmem [shape: f32[2,3,128], index: 7, kind: input, shape index: {}]   ;;  %s5417_s8 = inlined_call_operand.vmem [shape: f32[32,128], index: 8, kind: input, shape index: {}]   ;;  %s5418_s9 = inlined_call_operand.hbm [shape: f32[16,128], index: 9, kind: output, shape index: {}]  }
   0x1   :  { %v33_v0 = vld [vmem:[%s5409_s0] sm:$0xff]  ;;  %v34_v2 = vld [vmem:[%s5409_s0 + $0x8] sm:$0xff] }
   0x2   :  { %v35_v1 = vld [vmem:[%s5410_s1] sm:$0xff] }
   0x3   :  { %v4739_v3 = vadd.f32 %v35_v1, %v33_v0  ;;  %v4741_v4 = vadd.f32 %v35_v1, %v34_v2 }
   0x4   :  { %14 = vsyncpa [#allocation3], 0  ;;  %v88_v17 = vld [vmem:[%s5412_s3] sm:$0xff]  ;;  %v89_v18 = vld [vmem:[%s5412_s3 + $0x8] sm:$0xff]  ;;  %v38_v25 = vlaneseq  ;;  %v4661_v44 = vmov 0.0   ;;  %vm4662_vm1 = vmmov 0  }
   0x5   :  { %v49_v5 = vsel %vm48_vm0, %v4739_v3, 0.0  ;;  %v52_v6 = vsel %vm48_vm0, %v4741_v4, 0.0  ;;  %v90_v19 = vld [vmem:[%s5412_s3 + $0x10] sm:$0xff]  ;;  %v4406_v20 = vpack.c.bf16 %v89_v18, %v88_v17  ;;  %v91_v21 = vld [vmem:[%s5412_s3 + $0x18] sm:$0xff]  ;;  %v44_v32 = vld [vmem:[%s5411_s2] sm:$0x3]  ;;  %4130 = vmatprep.subr.mxu0 %v4661_v44  ;;  %4132 = vmatprep.mubr.msk.f32.mxu0 %vm4662_vm1, %v4661_v44 }
   0x6   :  { %50 = vadd.xlane.f32.xlu0 %v49_v5  ;;  %v4410_v22 = vpack.c.bf16 %v91_v21, %v90_v19  ;;  %v4763_v29 = vshrl.u32 %v38_v25, 7  ;;  %v4787_v45 = vld [vmem:[%s5416_s7] sm:$0x7]  ;;  %s4663_s25 = smov 96   ;;  %vm180_vm2 = vcmask 64512   ;;  %v41_v53 = vand.u32 127, %v38_v25 }
   0x7   :  { %4407 = vmatprep.subr.bf16.mxu1 %v4406_v20  ;;  %v4664_v54 = vmov -1e+30   ;;  %s4665_s26 = smov 64   ;;  %s4666_s27 = smov 88   ;;  %vm1541_vm4 = vcmask 195584   ;;  %vm1538_vm5 = vcmask 130048  }
   0x8   :  { %4409 = vmatpush3.bf16.msra.mxu1 %v4406_v20  ;;  %v4766_v31 = vsub.s32 0, %v4763_v29  ;;  %v4772_v33 = vsub.s32 1, %v4763_v29  ;;  %vm42_vm3 = vcmp.le.s32.totalorder %v41_v53, %v4763_v29  ;;  %s4667_s28 = smov 120   ;;  %s4668_s29 = smov 56  }
   0x9   :  { %4411 = vmatprep.subr.bf16.mxu1 %v4410_v22  ;;  %v4812_v55 = vsel %vm42_vm3, 0.0, %v4664_v54  ;;  %s4669_s30 = smov 80   ;;  %s4670_s10 = smov 112  }
   0xa   :  { %53 = vadd.xlane.f32.xlu0 %v52_v6  ;;  %v79_v34 = vrot.slane %v44_v32, %v4766_v31  ;;  %v85_v37 = vrot.slane %v44_v32, %v4772_v33  ;;  %v95_v46 = vrot.slane %v4787_v45, %v4766_v31  ;;  %s4671_s11 = smov 48   ;;  %s4672_s12 = smov 72  }
   0xb   :  { %s4673_s13 = smov 104   ;;  %s4674_s14 = smov 40  }
   0xc   :  { %4413 = vmatpush3.bf16.msra.mxu1 %v4410_v22  ;;  %s4675_s0 = smov 8   ;;  %s4676_s1 = smov 16  }
   0xd   :  { %4110 = vmatprep.subr.mxu1 %v4661_v44  ;;  %s5419_s23 = smov 24  }
  0x93   :  { %v51_v7 = vpop.xlane.xlu0 %50 }
  0x94   :  { %v56_v8 = vmul.f32 0.03125, %v51_v7 }
  0x96   :  { %v58_v9 = vsub.f32 %v4739_v3, %v56_v8 }
  0x97   :  { %v54_v10 = vpop.xlane.xlu0 %53 }
  0x98   :  { %v57_v11 = vmul.f32 0.03125, %v54_v10  ;;  %v60_v12 = vmul.f32 %v58_v9, %v58_v9 }
  0x9a   :  { %v59_v13 = vsub.f32 %v4741_v4, %v57_v11  ;;  %v62_v14 = vsel %vm48_vm0, %v60_v12, 0.0 }
  0x9b   :  { %63 = vadd.xlane.f32.xlu1 %v62_v14 }
  0x9c   :  { %v61_v15 = vmul.f32 %v59_v13, %v59_v13 }
  0x9e   :  { %v65_v16 = vsel %vm48_vm0, %v61_v15, 0.0 }
  0x9f   :  { %66 = vadd.xlane.f32.xlu1 %v65_v16 }
 0x128   :  { %v64_v23 = vpop.xlane.xlu1 %63 }
 0x129   :  { %v68_v24 = vmul.f32 0.03125, %v64_v23 }
 0x12b   :  { %v70_v26 = vadd.f32 1e-05, %v68_v24 }
 0x12c   :  { %v67_v27 = vpop.xlane.xlu1 %66 }
 0x12d   :  { %4545 = vrsqrt.f32 %v70_v26  ;;  %v69_v28 = vmul.f32 0.03125, %v67_v27 }
 0x12f   :  { %v71_v30 = vadd.f32 1e-05, %v69_v28 }
 0x131   :  { %4547 = vrsqrt.f32 %v71_v30 }
 0x137   :  { %v4546_v35 = vpop.eup %4545 }
 0x138   :  { %v74_v36 = vmul.f32 %v4546_v35, %v58_v9 }
 0x13a   :  { %v80_v38 = vmul.f32 %v79_v34, %v74_v36 }
 0x13b   :  { %v4548_v39 = vpop.eup %4547 }
 0x13c   :  { %v75_v40 = vmul.f32 %v4548_v39, %v59_v13  ;;  %v86_v41 = vadd.f32 %v85_v37, %v80_v38 }
 0x13e   :  { %v81_v42 = vmul.f32 %v79_v34, %v75_v40  ;;  %4107 = vmatprep.mubr.msk.f32.mxu1 %vm48_vm0, %v86_v41 }
 0x140   :  { %v87_v43 = vadd.f32 %v85_v37, %v81_v42 }
 0x142   :  { %4108 = vmatmul.mubr.msk.f32.vlgmr.msra.gmra.mrb[0].mxu1 %vm48_vm0, %v87_v43 }
 0x143   :  { %4112 = vmatprep.mubr.msk.f32.mxu1 %vm4662_vm1, %v4661_v44 }
 0x215   :  { %v4109_v47 = vpop.f32.mrb[0].mxu1 }
 0x216   :  { %v4791_v48 = vadd.f32 %v4109_v47, %v95_v46  ;;  %v168_v49 = vpop.f32.mrb[1].mxu1 }
 0x217   :  { %v4793_v50 = vadd.f32 %v168_v49, %v95_v46 }
 0x218   :  { %256 = vrot.lane.b32.xlu1 %v4791_v48, %s4663_s25 }
 0x219   :  { %178 = vrot.lane.b32.xlu0 %v4793_v50, %s4663_s25 }
 0x28a   :  { %v257_v52 = vpop.permute.xlu1 %256 }
 0x28b   :  { %v179_v51 = vpop.permute.xlu0 %178 }
 0x28c   :  { %4111 = vmatpush3.xpose.msk.msra.mxu1 %vm180_vm2, %v179_v51 }
 0x28d   :  { %4115 = vmatprep.subr.mxu1 %v4661_v44 }
 0x28f   :  { %4113 = vmatmul.mubr.msk.f32.vlgmr.msra.gmra.mrb[2].mxu1 %vm180_vm2, %v4793_v50 }
 0x290   :  { %4116 = vmatpush3.xpose.msk.msra.mxu1 %vm180_vm2, %v257_v52  ;;  %4117 = vmatprep.mubr.msk.f32.mxu1 %vm4662_vm1, %v4661_v44 }
 0x291   :  { %4120 = vmatprep.subr.mxu1 %v4661_v44 }
 0x293   :  { %4118 = vmatmul.mubr.msk.f32.vlgmr.msra.gmra.mrb[4].mxu1 %vm180_vm2, %v4791_v48 }
 0x294   :  { %4122 = vmatprep.mubr.msk.f32.mxu1 %vm4662_vm1, %v4661_v44 }
 0x362   :  { %v251_v56 = vpop.f32.mrb[2].mxu1 }
 0x363   :  { %v332_v57 = vmul.f32 0.35355338, %v251_v56  ;;  %v4114_v58 = vpop.f32.mrb[3].mxu1 }
 0x365   :  { %v334_v59 = vadd.f32 %v332_v57, %v4812_v55 }
 0x366   :  { %v328_v60 = vpop.f32.mrb[4].mxu1 }
 0x367   :  { %v333_v61 = vmul.f32 0.35355338, %v328_v60  ;;  %v4119_v62 = vpop.f32.mrb[5].mxu1  ;;  %v336_v63 = vsel %vm180_vm2, %v334_v59, -inf }
 0x368   :  { %337 = vmax.xlane.f32.xlu1 %v336_v63 }
 0x369   :  { %v335_v0 = vadd.f32 %v333_v61, %v4812_v55 }
 0x36b   :  { %v339_v1 = vsel %vm180_vm2, %v335_v0, -inf }
 0x36c   :  { %340 = vmax.xlane.f32.xlu0 %v339_v1 }
 0x379   :  { %434 = vrot.lane.b32.xlu1 %v4791_v48, %s4665_s26 }
 0x37d   :  { %512 = vrot.lane.b32.xlu1 %v4793_v50, %s4666_s27 }
 0x381   :  { %590 = vrot.lane.b32.xlu1 %v4791_v48, %s4666_s27 }
 0x3f5   :  { %v338_v2 = vpop.xlane.xlu1 %337 }
 0x3f6   :  { %v342_v5 = vsub.f32 %v334_v59, %v338_v2 }
 0x3f8   :  { %v344_v6 = vmul.f32 1.442695, %v342_v5 }
 0x3f9   :  { %v435_v7 = vpop.permute.xlu1 %434  ;;  %v341_v8 = vpop.xlane.xlu0 %340 }
 0x3fa   :  { %4549 = vpow2.f32 %v344_v6  ;;  %v343_v9 = vsub.f32 %v335_v0, %v341_v8 }
 0x3fc   :  { %v346_v10 = vmul.f32 1.442695, %v343_v9 }
 0x3fd   :  { %v513_v11 = vpop.permute.xlu1 %512 }
 0x3fe   :  { %4551 = vpow2.f32 %v346_v10  ;;  %4131 = vmatpush3.xpose.msk.msra.mxu0 %vm180_vm2, %v513_v11 }
 0x3ff   :  { %4140 = vmatprep.subr.mxu0 %v4661_v44 }
 0x401   :  { %v591_v16 = vpop.permute.xlu1 %590 }
 0x404   :  { %v4550_v12 = vpop.eup %4549 }
 0x405   :  { %v348_v13 = vsel %vm180_vm2, %v4550_v12, 0.0 }
 0x406   :  { %349 = vadd.xlane.f32.xlu0 %v348_v13 }
 0x408   :  { %v4552_v14 = vpop.eup %4551 }
 0x409   :  { %v351_v15 = vsel %vm180_vm2, %v4552_v14, 0.0 }
 0x40a   :  { %352 = vadd.xlane.f32.xlu1 %v351_v15 }
 0x41b   :  { %588 = vrot.lane.b32.xlu1 %v4791_v48, %s4667_s28 }
 0x41c   :  { %358 = vrot.lane.b32.xlu0 %v4793_v50, %s4665_s26 }
 0x420   :  { %510 = vrot.lane.b32.xlu0 %v4793_v50, %s4667_s28 }
 0x493   :  { %v350_v17 = vpop.xlane.xlu0 %349 }
 0x494   :  { %4553 = vrcp.f32 %v350_v17 }
 0x497   :  { %v353_v18 = vpop.xlane.xlu1 %352  ;;  %v359_v19 = vpop.permute.xlu0 %358 }
 0x498   :  { %4555 = vrcp.f32 %v353_v18  ;;  %4121 = vmatpush3.msra.mxu1 %v359_v19 }
 0x499   :  { %4125 = vmatprep.subr.mxu1 %v4661_v44 }
 0x49b   :  { %v511_v20 = vpop.permute.xlu0 %510  ;;  %v589_v25 = vpop.permute.xlu1 %588 }
 0x49c   :  { %4133 = vmatmul.mubr.msk.f32.vlgmr.msra.gmra.mrb[0].mxu0 %vm180_vm2, %v511_v20 }
 0x49d   :  { %4142 = vmatprep.mubr.msk.f32.mxu0 %vm4662_vm1, %v4661_v44 }
 0x49e   :  { %v4554_v21 = vpop.eup %4553 }
 0x49f   :  { %v355_v22 = vmul.f32 %v4554_v21, %v4550_v12 }
 0x4a1   :  { %4123 = vmatmul.mubr.msk.f32.vlgmr.msra.gmra.mrb[6].mxu1 %vm180_vm2, %v355_v22 }
 0x4a2   :  { %v4556_v23 = vpop.eup %4555  ;;  %4126 = vmatpush3.msra.mxu1 %v435_v7  ;;  %4127 = vmatprep.mubr.msk.f32.mxu1 %vm4662_vm1, %v4661_v44 }
 0x4a3   :  { %v357_v24 = vmul.f32 %v4556_v23, %v4552_v14  ;;  %4135 = vmatprep.subr.mxu1 %v4661_v44 }
 0x4a5   :  { %4128 = vmatmul.mubr.msk.f32.vlgmr.msra.gmra.mrb[8].mxu1 %vm180_vm2, %v357_v24 }
 0x4a6   :  { %4137 = vmatprep.mubr.msk.f32.mxu1 %vm4662_vm1, %v4661_v44 }
 0x4a9   :  { %4136 = vmatpush3.xpose.msk.msra.mxu1 %vm180_vm2, %v591_v16 }
 0x4aa   :  { %4145 = vmatprep.subr.mxu1 %v4661_v44 }
 0x4ac   :  { %4138 = vmatmul.mubr.msk.f32.vlgmr.msra.gmra.mrb[10].mxu1 %vm180_vm2, %v589_v25 }
 0x4ad   :  { %4147 = vmatprep.mubr.msk.f32.mxu1 %vm4662_vm1, %v4661_v44 }
 0x56f   :  { %v584_v26 = vpop.f32.mrb[0].mxu0 }
 0x570   :  { %v666_v27 = vmul.f32 0.35355338, %v584_v26  ;;  %v4134_v28 = vpop.f32.mrb[1].mxu0 }
 0x572   :  { %v668_v30 = vadd.f32 %v666_v27, %v4812_v55 }
 0x574   :  { %v4851_v32 = vpop.f32.mrb[6].mxu1  ;;  %v670_v34 = vsel %vm180_vm2, %v668_v30, -inf }
 0x575   :  { %671 = vmax.xlane.f32.xlu0 %v670_v34  ;;  %v4124_v35 = vpop.f32.mrb[7].mxu1 }
 0x578   :  { %v4854_v36 = vpop.f32.mrb[8].mxu1 }
 0x579   :  { %v4129_v37 = vpop.f32.mrb[9].mxu1 }
 0x57f   :  { %v662_v38 = vpop.f32.mrb[10].mxu1 }
 0x580   :  { %v667_v39 = vmul.f32 0.35355338, %v662_v38  ;;  %v4139_v40 = vpop.f32.mrb[11].mxu1 }
 0x582   :  { %v669_v41 = vadd.f32 %v667_v39, %v4812_v55 }
 0x584   :  { %v673_v42 = vsel %vm180_vm2, %v669_v41, -inf }
 0x585   :  { %674 = vmax.xlane.f32.xlu1 %v673_v42 }
 0x596   :  { %768 = vrot.lane.b32.xlu1 %v4791_v48, %s4668_s29 }
 0x59a   :  { %846 = vrot.lane.b32.xlu1 %v4793_v50, %s4669_s30 }
 0x59e   :  { %924 = vrot.lane.b32.xlu1 %v4791_v48, %s4669_s30 }
 0x5a2   :  { %922 = vrot.lane.b32.xlu1 %v4791_v48, %s4670_s10 }
 0x602   :  { %v672_v43 = vpop.xlane.xlu0 %671 }
 0x603   :  { %v676_v46 = vsub.f32 %v668_v30, %v672_v43 }
 0x605   :  { %v678_v47 = vmul.f32 1.442695, %v676_v46 }
 0x607   :  { %4557 = vpow2.f32 %v678_v47 }
 0x611   :  { %v4558_v49 = vpop.eup %4557 }
 0x612   :  { %v675_v51 = vpop.xlane.xlu1 %674  ;;  %v682_v52 = vsel %vm180_vm2, %v4558_v49, 0.0 }
 0x613   :  { %683 = vadd.xlane.f32.xlu0 %v682_v52  ;;  %v677_v54 = vsub.f32 %v669_v41, %v675_v51 }
 0x615   :  { %v680_v56 = vmul.f32 1.442695, %v677_v54 }
 0x616   :  { %v769_v53 = vpop.permute.xlu1 %768 }
 0x617   :  { %4146 = vmatpush3.msra.mxu1 %v769_v53  ;;  %4559 = vpow2.f32 %v680_v56 }
 0x618   :  { %4155 = vmatprep.subr.mxu1 %v4661_v44 }
 0x61a   :  { %v847_v63 = vpop.permute.xlu1 %846 }
 0x61e   :  { %v925_v5 = vpop.permute.xlu1 %924 }
 0x621   :  { %v4560_v57 = vpop.eup %4559 }
 0x622   :  { %v685_v58 = vsel %vm180_vm2, %v4560_v57, 0.0  ;;  %v923_v7 = vpop.permute.xlu1 %922 }
 0x629   :  { %692 = vrot.lane.b32.xlu0 %v4793_v50, %s4668_s29 }
 0x648   :  { %686 = vadd.xlane.f32.xlu0 %v685_v58 }
 0x65e   :  { %844 = vrot.lane.b32.xlu0 %v4793_v50, %s4670_s10 }
 0x6a0   :  { %v684_v59 = vpop.xlane.xlu0 %683 }
 0x6a1   :  { %4561 = vrcp.f32 %v684_v59 }
 0x6a4   :  { %v693_v60 = vpop.permute.xlu0 %692 }
 0x6a5   :  { %4141 = vmatpush3.msra.mxu0 %v693_v60 }
 0x6a6   :  { %4150 = vmatprep.subr.mxu0 %v4661_v44 }
 0x6ab   :  { %v4562_v61 = vpop.eup %4561 }
 0x6ac   :  { %v689_v62 = vmul.f32 %v4562_v61, %v4558_v49 }
 0x6ae   :  { %4143 = vmatmul.mubr.msk.f32.vlgmr.msra.gmra.mrb[2].mxu0 %vm180_vm2, %v689_v62 }
 0x6af   :  { %4151 = vmatpush3.xpose.msk.msra.mxu0 %vm180_vm2, %v847_v63  ;;  %4152 = vmatprep.mubr.msk.f32.mxu0 %vm4662_vm1, %v4661_v44 }
 0x6b0   :  { %4160 = vmatprep.subr.mxu0 %v4661_v44 }
 0x6d5   :  { %v687_v0 = vpop.xlane.xlu0 %686 }
 0x6d6   :  { %4563 = vrcp.f32 %v687_v0 }
 0x6d9   :  { %v845_v1 = vpop.permute.xlu0 %844 }
 0x6da   :  { %4153 = vmatmul.mubr.msk.f32.vlgmr.msra.gmra.mrb[4].mxu0 %vm180_vm2, %v845_v1 }
 0x6db   :  { %4162 = vmatprep.mubr.msk.f32.mxu0 %vm4662_vm1, %v4661_v44 }
 0x6e0   :  { %v4564_v2 = vpop.eup %4563 }
 0x6e1   :  { %v691_v6 = vmul.f32 %v4564_v2, %v4560_v57 }
 0x6e3   :  { %4148 = vmatmul.mubr.msk.f32.vlgmr.msra.gmra.mrb[12].mxu1 %vm180_vm2, %v691_v6 }
 0x6e4   :  { %4156 = vmatpush3.xpose.msk.msra.mxu1 %vm180_vm2, %v925_v5  ;;  %4157 = vmatprep.mubr.msk.f32.mxu1 %vm4662_vm1, %v4661_v44 }
 0x6e5   :  { %4165 = vmatprep.subr.mxu1 %v4661_v44 }
 0x6e7   :  { %4158 = vmatmul.mubr.msk.f32.vlgmr.msra.gmra.mrb[14].mxu1 %vm180_vm2, %v923_v7 }
 0x6e8   :  { %4167 = vmatprep.mubr.msk.f32.mxu1 %vm4662_vm1, %v4661_v44 }
 0x781   :  { %v4890_v8 = vpop.f32.mrb[2].mxu0 }
 0x782   :  { %v4144_v9 = vpop.f32.mrb[3].mxu0 }
 0x7ad   :  { %v918_v10 = vpop.f32.mrb[4].mxu0 }
 0x7ae   :  { %v1000_v11 = vmul.f32 0.35355338, %v918_v10  ;;  %v4154_v12 = vpop.f32.mrb[5].mxu0 }
 0x7b0   :  { %v1002_v13 = vadd.f32 %v1000_v11, %v4812_v55 }
 0x7b2   :  { %v1004_v14 = vsel %vm180_vm2, %v1002_v13, -inf }
 0x7b3   :  { %1005 = vmax.xlane.f32.xlu0 %v1004_v14 }
 0x7b6   :  { %v4894_v15 = vpop.f32.mrb[12].mxu1 }
 0x7b7   :  { %v4149_v16 = vpop.f32.mrb[13].mxu1 }
 0x7ba   :  { %v996_v17 = vpop.f32.mrb[14].mxu1 }
 0x7bb   :  { %v1001_v18 = vmul.f32 0.35355338, %v996_v17  ;;  %v4159_v19 = vpop.f32.mrb[15].mxu1 }
 0x7bd   :  { %v1003_v20 = vadd.f32 %v1001_v18, %v4812_v55 }
 0x7bf   :  { %v1007_v21 = vsel %vm180_vm2, %v1003_v20, -inf }
 0x7c0   :  { %1008 = vmax.xlane.f32.xlu1 %v1007_v21 }
 0x7d1   :  { %1102 = vrot.lane.b32.xlu1 %v4791_v48, %s4671_s11 }
 0x7d5   :  { %1180 = vrot.lane.b32.xlu1 %v4793_v50, %s4672_s12 }
 0x7d9   :  { %1258 = vrot.lane.b32.xlu1 %v4791_v48, %s4672_s12 }
 0x7dd   :  { %1256 = vrot.lane.b32.xlu1 %v4791_v48, %s4673_s13 }
 0x840   :  { %v1006_v22 = vpop.xlane.xlu0 %1005 }
 0x841   :  { %v1010_v23 = vsub.f32 %v1002_v13, %v1006_v22 }
 0x843   :  { %v1012_v24 = vmul.f32 1.442695, %v1010_v23  ;;  %v1545_v23 = vld [vmem:[%s5413_s4 + $0x8] sm:$0xff] }
 0x845   :  { %4565 = vpow2.f32 %v1012_v24 }
 0x84d   :  { %v1009_v25 = vpop.xlane.xlu1 %1008 }
 0x84e   :  { %v1011_v30 = vsub.f32 %v1003_v20, %v1009_v25  ;;  %v1546_v25 = vld [vmem:[%s5413_s4 + $0x10] sm:$0xff] }
 0x84f   :  { %v4566_v26 = vpop.eup %4565 }
 0x850   :  { %v1016_v27 = vsel %vm180_vm2, %v4566_v26, 0.0  ;;  %v1014_v34 = vmul.f32 1.442695, %v1011_v30 }
 0x851   :  { %1017 = vadd.xlane.f32.xlu0 %v1016_v27  ;;  %v1103_v28 = vpop.permute.xlu1 %1102 }
 0x852   :  { %4166 = vmatpush3.msra.mxu1 %v1103_v28  ;;  %4567 = vpow2.f32 %v1014_v34 }
 0x853   :  { %4175 = vmatprep.subr.mxu1 %v4661_v44 }
 0x855   :  { %v1181_v42 = vpop.permute.xlu1 %1180 }
 0x859   :  { %v1259_v49 = vpop.permute.xlu1 %1258 }
 0x85c   :  { %v4568_v35 = vpop.eup %4567 }
 0x85d   :  { %v1019_v37 = vsel %vm180_vm2, %v4568_v35, 0.0  ;;  %v1257_v52 = vpop.permute.xlu1 %1256 }
 0x867   :  { %1026 = vrot.lane.b32.xlu0 %v4793_v50, %s4671_s11 }
 0x886   :  { %1020 = vadd.xlane.f32.xlu0 %v1019_v37 }
 0x89c   :  { %1178 = vrot.lane.b32.xlu0 %v4793_v50, %s4673_s13 }
 0x8de   :  { %v1018_v38 = vpop.xlane.xlu0 %1017 }
 0x8df   :  { %4569 = vrcp.f32 %v1018_v38 }
 0x8e2   :  { %v1027_v39 = vpop.permute.xlu0 %1026 }
 0x8e3   :  { %4161 = vmatpush3.msra.mxu0 %v1027_v39 }
 0x8e4   :  { %4170 = vmatprep.subr.mxu0 %v4661_v44 }
 0x8e9   :  { %v4570_v40 = vpop.eup %4569 }
 0x8ea   :  { %v1023_v41 = vmul.f32 %v4570_v40, %v4566_v26  ;;  %v1547_v26 = vld [vmem:[%s5413_s4 + $0x18] sm:$0xff] }
 0x8eb   :  { %v4418_v27 = vpack.c.bf16 %v1547_v26, %v1546_v25 }
 0x8ec   :  { %4163 = vmatmul.mubr.msk.f32.vlgmr.msra.gmra.mrb[6].mxu0 %vm180_vm2, %v1023_v41 }
 0x8ed   :  { %4171 = vmatpush3.xpose.msk.msra.mxu0 %vm180_vm2, %v1181_v42  ;;  %4172 = vmatprep.mubr.msk.f32.mxu0 %vm4662_vm1, %v4661_v44 }
 0x8ee   :  { %4180 = vmatprep.subr.mxu0 %v4661_v44 }
 0x913   :  { %v1021_v43 = vpop.xlane.xlu0 %1020 }
 0x914   :  { %4571 = vrcp.f32 %v1021_v43 }
 0x917   :  { %v1179_v46 = vpop.permute.xlu0 %1178 }
 0x918   :  { %4173 = vmatmul.mubr.msk.f32.vlgmr.msra.gmra.mrb[8].mxu0 %vm180_vm2, %v1179_v46 }
 0x919   :  { %4182 = vmatprep.mubr.msk.f32.mxu0 %vm4662_vm1, %v4661_v44 }
 0x91e   :  { %v4572_v47 = vpop.eup %4571 }
 0x91f   :  { %v1025_v51 = vmul.f32 %v4572_v47, %v4568_v35 }
 0x921   :  { %4168 = vmatmul.mubr.msk.f32.vlgmr.msra.gmra.mrb[16].mxu1 %vm180_vm2, %v1025_v51 }
 0x922   :  { %4176 = vmatpush3.xpose.msk.msra.mxu1 %vm180_vm2, %v1259_v49  ;;  %4177 = vmatprep.mubr.msk.f32.mxu1 %vm4662_vm1, %v4661_v44 }
 0x923   :  { %4185 = vmatprep.subr.mxu1 %v4661_v44 }
 0x925   :  { %4178 = vmatmul.mubr.msk.f32.vlgmr.msra.gmra.mrb[18].mxu1 %vm180_vm2, %v1257_v52 }
 0x926   :  { %4187 = vmatprep.mubr.msk.f32.mxu1 %vm4662_vm1, %v4661_v44 }
 0x9bf   :  { %v1098_v53 = vpop.f32.mrb[6].mxu0 }
 0x9c0   :  { %v4164_v54 = vpop.f32.mrb[7].mxu0 }
 0x9eb   :  { %v1252_v56 = vpop.f32.mrb[8].mxu0 }
 0x9ec   :  { %v1334_v57 = vmul.f32 0.35355338, %v1252_v56  ;;  %v4174_v58 = vpop.f32.mrb[9].mxu0 }
 0x9ee   :  { %v1336_v59 = vadd.f32 %v1334_v57, %v4812_v55 }
 0x9f0   :  { %v1338_v60 = vsel %vm180_vm2, %v1336_v59, -inf }
 0x9f1   :  { %1339 = vmax.xlane.f32.xlu0 %v1338_v60 }
 0x9f4   :  { %v1174_v61 = vpop.f32.mrb[16].mxu1 }
 0x9f5   :  { %v4169_v62 = vpop.f32.mrb[17].mxu1 }
 0x9f8   :  { %v1330_v63 = vpop.f32.mrb[18].mxu1 }
 0x9f9   :  { %v1335_v0 = vmul.f32 0.35355338, %v1330_v63  ;;  %v4179_v1 = vpop.f32.mrb[19].mxu1 }
 0x9fb   :  { %v1337_v2 = vadd.f32 %v1335_v0, %v4812_v55 }
 0x9fd   :  { %v1341_v5 = vsel %vm180_vm2, %v1337_v2, -inf }
 0x9fe   :  { %1342 = vmax.xlane.f32.xlu1 %v1341_v5 }
 0xa0f   :  { %1436 = vrot.lane.b32.xlu1 %v4791_v48, %s4674_s14 }
 0xa13   :  { %1514 = vrot.lane.b32.xlu1 %v4890_v8, %s4675_s0 }
 0xa17   :  { %1516 = vrot.lane.b32.xlu1 %v4894_v15, %s4675_s0 }
 0xa1b   :  { %1524 = vrot.lane.b32.xlu1 %v1174_v61, %s4676_s1 }
 0xa7e   :  { %v1340_v6 = vpop.xlane.xlu0 %1339 }
 0xa7f   :  { %v1344_v7 = vsub.f32 %v1336_v59, %v1340_v6 }
 0xa81   :  { %v1346_v9 = vmul.f32 1.442695, %v1344_v7 }
 0xa83   :  { %4573 = vpow2.f32 %v1346_v9  ;;  %v1675_v9 = vld [vmem:[%s5414_s5] sm:$0xff] }
 0xa8b   :  { %v1343_v10 = vpop.xlane.xlu1 %1342 }
 0xa8c   :  { %v1345_v11 = vsub.f32 %v1337_v2, %v1343_v10  ;;  %v1676_v10 = vld [vmem:[%s5414_s5 + $0x8] sm:$0xff] }
 0xa8d   :  { %v4574_v12 = vpop.eup %4573 }
 0xa8e   :  { %v1348_v13 = vmul.f32 1.442695, %v1345_v11  ;;  %v1350_v48 = vsel %vm180_vm2, %v4574_v12, 0.0  ;;  %v4422_v11 = vpack.c.bf16 %v1676_v10, %v1675_v9 }
 0xa8f   :  { %1351 = vadd.xlane.f32.xlu0 %v1350_v48  ;;  %v1437_v14 = vpop.permute.xlu1 %1436 }
 0xa90   :  { %4575 = vpow2.f32 %v1348_v13  ;;  %4186 = vmatpush3.msra.mxu1 %v1437_v14  ;;  %v1678_v13 = vld [vmem:[%s5414_s5 + $0x18] sm:$0xff]  ;;  %v1782_v14 = vld [vmem:[%s5415_s6] sm:$0xff] }
 0xa91   :  { %4423 = vmatprep.subr.bf16.mxu1 %v4422_v11 }
 0xa93   :  { %v1515_v37 = vpop.permute.xlu1 %1514 }
 0xa94   :  { %v1536_v40 = vsel %vm180_vm2, %v4851_v32, %v1515_v37  ;;  %v1633_v32 = vsub.s32 2, %v4763_v29  ;;  %v1784_v37 = vld [vmem:[%s5415_s6 + $0x10] sm:$0xff] }
 0xa97   :  { %v1517_v39 = vpop.permute.xlu1 %1516 }
 0xa98   :  { %v1537_v47 = vsel %vm180_vm2, %v4854_v36, %v1517_v39 }
 0xa9a   :  { %v4576_v8 = vpop.eup %4575 }
 0xa9b   :  { %v1353_v15 = vsel %vm180_vm2, %v4576_v8, 0.0  ;;  %v1525_v46 = vpop.permute.xlu1 %1524 }
 0xa9c   :  { %1354 = vadd.xlane.f32.xlu0 %v1353_v15  ;;  %v1540_v49 = vsel %vm1538_vm5, %v1537_v47, %v1525_v46  ;;  %v1789_v46 = vld [vmem:[%s5415_s6 + $0x38] sm:$0xff] }
 0xab2   :  { %1360 = vrot.lane.b32.xlu0 %v4793_v50, %s4674_s14  ;;  %v1544_v50 = vld [vmem:[%s5413_s4] sm:$0xff] }
 0xab3   :  { %v4414_v24 = vpack.c.bf16 %v1545_v23, %v1544_v50 }
 0xab6   :  { %1522 = vrot.lane.b32.xlu0 %v1098_v53, %s4676_s1  ;;  %v1634_v53 = vrot.slane %v4787_v45, %v1633_v32 }
 0xb1c   :  { %v1352_v16 = vpop.xlane.xlu0 %1351 }
 0xb1d   :  { %4577 = vrcp.f32 %v1352_v16 }
 0xb27   :  { %v4578_v18 = vpop.eup %4577 }
 0xb28   :  { %v1357_v19 = vmul.f32 %v4578_v18, %v4574_v12  ;;  %v1677_v12 = vld [vmem:[%s5414_s5 + $0x10] sm:$0xff] }
 0xb29   :  { %v1355_v17 = vpop.xlane.xlu0 %1354  ;;  %v4426_v48 = vpack.c.bf16 %v1678_v13, %v1677_v12 }
 0xb2a   :  { %4579 = vrcp.f32 %v1355_v17 }
 0xb2d   :  { %v1361_v20 = vpop.permute.xlu0 %1360 }
 0xb2e   :  { %4181 = vmatpush3.msra.mxu0 %v1361_v20 }
 0xb2f   :  { %4183 = vmatmul.mubr.msk.f32.vlgmr.msra.gmra.mrb[10].mxu0 %vm180_vm2, %v1357_v19  ;;  %4415 = vmatprep.subr.bf16.mxu0 %v4414_v24 }
 0xb30   :  { %4417 = vmatpush3.bf16.msra.mxu0 %v4414_v24 }
 0xb31   :  { %4419 = vmatprep.subr.bf16.mxu0 %v4418_v27  ;;  %v1523_v38 = vpop.permute.xlu0 %1522 }
 0xb32   :  { %v1539_v41 = vsel %vm1538_vm5, %v1536_v40, %v1523_v38  ;;  %v1785_v38 = vld [vmem:[%s5415_s6 + $0x18] sm:$0xff]  ;;  %v1786_v40 = vld [vmem:[%s5415_s6 + $0x20] sm:$0xff] }
 0xb33   :  { %v4434_v39 = vpack.c.bf16 %v1785_v38, %v1784_v37 }
 0xb34   :  { %v4580_v21 = vpop.eup %4579  ;;  %4421 = vmatpush3.bf16.msra.mxu0 %v4418_v27 }
 0xb35   :  { %v1359_v22 = vmul.f32 %v4580_v21, %v4576_v8  ;;  %v1783_v8 = vld [vmem:[%s5415_s6 + $0x8] sm:$0xff] }
 0xb36   :  { %v4430_v15 = vpack.c.bf16 %v1783_v8, %v1782_v14 }
 0xb37   :  { %4188 = vmatmul.mubr.msk.f32.vlgmr.msra.gmra.mrb[20].mxu1 %vm180_vm2, %v1359_v22  ;;  %v3862_v22 = vld [vmem:[%s5411_s2 + $0x2] sm:$0x3] }
 0xb38   :  { %4425 = vmatpush3.bf16.msra.mxu1 %v4422_v11  ;;  %4431 = vmatprep.subr.bf16.mxu0 %v4430_v15  ;;  %v1666_v50 = vrot.slane %v3862_v22, %v4766_v31  ;;  %v1672_v25 = vrot.slane %v3862_v22, %v4772_v33 }
 0xb39   :  { %4427 = vmatprep.subr.bf16.mxu1 %v4426_v48 }
 0xb3c   :  { %4429 = vmatpush3.bf16.msra.mxu1 %v4426_v48 }
 0xc02   :  { %v1432_v28 = vpop.f32.mrb[10].mxu0 }
 0xc03   :  { %1530 = vrot.lane.b32.xlu0 %v1432_v28, %s5419_s23  ;;  %v4184_v30 = vpop.f32.mrb[11].mxu0 }
 0xc0a   :  { %v1508_v34 = vpop.f32.mrb[20].mxu1 }
 0xc0b   :  { %1532 = vrot.lane.b32.xlu1 %v1508_v34, %s5419_s23  ;;  %v4189_v35 = vpop.f32.mrb[21].mxu1 }
 0xc75   :  { %v1531_v42 = vpop.permute.xlu0 %1530 }
 0xc76   :  { %v1542_v43 = vsel %vm1541_vm4, %v1539_v41, %v1531_v42  ;;  %v1787_v41 = vld [vmem:[%s5415_s6 + $0x28] sm:$0xff] }
 0xc77   :  { %4198 = vmatprep.mubr.msk.f32.mxu0 %vm48_vm0, %v1542_v43  ;;  %v4438_v42 = vpack.c.bf16 %v1787_v41, %v1786_v40  ;;  %v1788_v43 = vld [vmem:[%s5415_s6 + $0x30] sm:$0xff] }
 0xc78   :  { %v4442_v47 = vpack.c.bf16 %v1789_v46, %v1788_v43  ;;  %v3897_v43 = vld [vmem:[%s5412_s3 + $0x28] sm:$0xff] }
 0xc7d   :  { %v1533_v51 = vpop.permute.xlu1 %1532 }
 0xc7e   :  { %v1543_v52 = vsel %vm1541_vm4, %v1540_v49, %v1533_v51  ;;  %v1790_v49 = vld [vmem:[%s5415_s6 + $0x40] sm:$0xff]  ;;  %v1791_v51 = vld [vmem:[%s5415_s6 + $0x48] sm:$0xff] }
 0xc7f   :  { %4199 = vmatmul.mubr.msk.f32.vlgmr.msra.gmra.mrb[12].mxu0 %vm48_vm0, %v1543_v52  ;;  %v4446_v52 = vpack.c.bf16 %v1791_v51, %v1790_v49  ;;  %v3899_v49 = vld [vmem:[%s5412_s3 + $0x38] sm:$0xff] }
 0xc80   :  { %4433 = vmatpush3.bf16.msra.mxu0 %v4430_v15 }
 0xc81   :  { %4435 = vmatprep.subr.bf16.mxu0 %v4434_v39 }
 0xc84   :  { %4437 = vmatpush3.bf16.msra.mxu0 %v4434_v39 }
 0xc85   :  { %4439 = vmatprep.subr.bf16.mxu0 %v4438_v42 }
 0xc88   :  { %4441 = vmatpush3.bf16.msra.mxu0 %v4438_v42  ;;  %v3896_v42 = vld [vmem:[%s5412_s3 + $0x20] sm:$0xff] }
 0xc89   :  { %4443 = vmatprep.subr.bf16.mxu0 %v4442_v47  ;;  %v4462_v46 = vpack.c.bf16 %v3897_v43, %v3896_v42 }
 0xc8b   :  { %4463 = vmatprep.subr.bf16.mxu1 %v4462_v46 }
 0xc8c   :  { %4445 = vmatpush3.bf16.msra.mxu0 %v4442_v47  ;;  %v3898_v47 = vld [vmem:[%s5412_s3 + $0x30] sm:$0xff] }
 0xc8d   :  { %4447 = vmatprep.subr.bf16.mxu0 %v4446_v52  ;;  %v4466_v51 = vpack.c.bf16 %v3899_v49, %v3898_v47 }
 0xc90   :  { %4449 = vmatpush3.bf16.msra.mxu0 %v4446_v52 }
 0xd52   :  { %v4200_v54 = vpop.f32.mrb[12].mxu0 }
 0xd53   :  { %v1630_v56 = vadd.f32 %v4200_v54, %v4741_v4  ;;  %v1620_v57 = vpop.f32.mrb[13].mxu0  ;;  %v1793_v54 = vld [vmem:[%s5415_s6 + $0x58] sm:$0xff] }
 0xd54   :  { %v1629_v58 = vadd.f32 %v1620_v57, %v4739_v3  ;;  %v1794_v57 = vld [vmem:[%s5415_s6 + $0x60] sm:$0xff] }
 0xd55   :  { %v4978_v36 = vadd.f32 %v1634_v53, %v1630_v56 }
 0xd56   :  { %v4980_v59 = vadd.f32 %v1634_v53, %v1629_v58  ;;  %v1795_v58 = vld [vmem:[%s5415_s6 + $0x68] sm:$0xff] }
 0xd57   :  { %v1640_v60 = vsel %vm48_vm0, %v4978_v36, 0.0 }
 0xd58   :  { %1641 = vadd.xlane.f32.xlu1 %v1640_v60  ;;  %v1637_v61 = vsel %vm48_vm0, %v4980_v59, 0.0  ;;  %v4454_v60 = vpack.c.bf16 %v1795_v58, %v1794_v57 }
 0xd59   :  { %1638 = vadd.xlane.f32.xlu0 %v1637_v61  ;;  %v1796_v61 = vld [vmem:[%s5415_s6 + $0x70] sm:$0xff] }
 0xde5   :  { %v1642_v62 = vpop.xlane.xlu1 %1641 }
 0xde6   :  { %v1644_v63 = vmul.f32 0.03125, %v1642_v62  ;;  %v1639_v0 = vpop.xlane.xlu0 %1638  ;;  %v1797_v62 = vld [vmem:[%s5415_s6 + $0x78] sm:$0xff] }
 0xde7   :  { %v1643_v1 = vmul.f32 0.03125, %v1639_v0  ;;  %v1682_v0 = vrot.slane %v4787_v45, %v4772_v33 }
 0xde8   :  { %v1646_v4 = vsub.f32 %v4978_v36, %v1644_v63  ;;  %v4458_v63 = vpack.c.bf16 %v1797_v62, %v1796_v61 }
 0xde9   :  { %v1645_v3 = vsub.f32 %v4980_v59, %v1643_v1 }
 0xdea   :  { %v1648_v6 = vmul.f32 %v1646_v4, %v1646_v4 }
 0xdeb   :  { %v1647_v2 = vmul.f32 %v1645_v3, %v1645_v3 }
 0xdec   :  { %v1652_v7 = vsel %vm48_vm0, %v1648_v6, 0.0 }
 0xded   :  { %v1649_v5 = vsel %vm48_vm0, %v1647_v2, 0.0 }
 0xdee   :  { %1650 = vadd.xlane.f32.xlu0 %v1649_v5 }
 0xdf2   :  { %1653 = vadd.xlane.f32.xlu0 %v1652_v7 }
 0xe08   :  { %1876 = vrot.lane.b32.xlu0 %v1634_v53, %s4663_s25  ;;  %v1792_v53 = vld [vmem:[%s5415_s6 + $0x50] sm:$0xff] }
 0xe09   :  { %v4450_v56 = vpack.c.bf16 %v1793_v54, %v1792_v53 }
 0xe0b   :  { %4451 = vmatprep.subr.bf16.mxu0 %v4450_v56 }
 0xe0c   :  { %4453 = vmatpush3.bf16.msra.mxu0 %v4450_v56 }
 0xe0d   :  { %4455 = vmatprep.subr.bf16.mxu0 %v4454_v60 }
 0xe10   :  { %4457 = vmatpush3.bf16.msra.mxu0 %v4454_v60  ;;  %v3893_v60 = vld [vmem:[%s5411_s2 + $0x4] sm:$0x3] }
 0xe11   :  { %4459 = vmatprep.subr.bf16.mxu0 %v4458_v63  ;;  %v1916_v61 = vrot.slane %v3893_v60, %v4766_v31 }
 0xe14   :  { %4461 = vmatpush3.bf16.msra.mxu0 %v4458_v63 }
 0xe15   :  { %4288 = vmatprep.subr.mxu0 %v4661_v44 }
 0xe7b   :  { %v1651_v16 = vpop.xlane.xlu0 %1650 }
 0xe7c   :  { %v1655_v17 = vmul.f32 0.03125, %v1651_v16 }
 0xe7e   :  { %v1657_v18 = vadd.f32 1e-05, %v1655_v17 }
 0xe7f   :  { %v1654_v19 = vpop.xlane.xlu0 %1653 }
 0xe80   :  { %4581 = vrsqrt.f32 %v1657_v18  ;;  %v1656_v20 = vmul.f32 0.03125, %v1654_v19 }
 0xe82   :  { %v1658_v21 = vadd.f32 1e-05, %v1656_v20 }
 0xe84   :  { %4583 = vrsqrt.f32 %v1658_v21 }
 0xe8a   :  { %v4582_v23 = vpop.eup %4581 }
 0xe8b   :  { %v1661_v24 = vmul.f32 %v4582_v23, %v1645_v3 }
 0xe8d   :  { %v1667_v26 = vmul.f32 %v1666_v50, %v1661_v24 }
 0xe8e   :  { %v4584_v27 = vpop.eup %4583 }
 0xe8f   :  { %v1662_v28 = vmul.f32 %v4584_v27, %v1646_v4  ;;  %v1673_v30 = vadd.f32 %v1672_v25, %v1667_v26 }
 0xe91   :  { %v1668_v34 = vmul.f32 %v1666_v50, %v1662_v28  ;;  %4209 = vmatprep.mubr.msk.f32.mxu1 %vm48_vm0, %v1673_v30  ;;  %v1877_v50 = vpop.permute.xlu0 %1876 }
 0xe93   :  { %v1674_v35 = vadd.f32 %v1672_v25, %v1668_v34 }
 0xe95   :  { %4210 = vmatmul.mubr.msk.f32.vlgmr.msra.gmra.mrb[22].mxu1 %vm48_vm0, %v1674_v35 }
 0xe96   :  { %4465 = vmatpush3.bf16.msra.mxu1 %v4462_v46 }
 0xe97   :  { %4467 = vmatprep.subr.bf16.mxu1 %v4466_v51 }
 0xe9a   :  { %4469 = vmatpush3.bf16.msra.mxu1 %v4466_v51 }
 0xe9b   :  { %4258 = vmatprep.subr.mxu1 %v4661_v44 }
 0xf68   :  { %v4211_v1 = vpop.f32.mrb[22].mxu1 }
 0xf69   :  { %v1761_v4 = vadd.f32 %v4211_v1, %v1682_v0  ;;  %v1755_v3 = vpop.f32.mrb[23].mxu1 }
 0xf6a   :  { %v1756_v2 = vadd.f32 %v1755_v3, %v1682_v0  ;;  %v1922_v0 = vrot.slane %v3893_v60, %v4772_v33 }
 0xf6b   :  { %v1767_v5 = vmul.f32 0.044715, %v1761_v4  ;;  %v1765_v18 = vmul.f32 0.5, %v1761_v4 }
 0xf6c   :  { %v1766_v6 = vmul.f32 0.044715, %v1756_v2  ;;  %v1764_v45 = vmul.f32 0.5, %v1756_v2 }
 0xf6d   :  { %v1769_v7 = vmul.f32 %v1767_v5, %v1761_v4 }
 0xf6e   :  { %v1768_v9 = vmul.f32 %v1766_v6, %v1756_v2 }
 0xf6f   :  { %v1771_v10 = vmul.f32 %v1769_v7, %v1761_v4  ;;  %v5102_v7 = vld [vmem:[%s5416_s7 + $0x4] sm:$0x7] }
 0xf70   :  { %v1770_v11 = vmul.f32 %v1768_v9, %v1756_v2  ;;  %v1933_v9 = vrot.slane %v5102_v7, %v4766_v31 }
 0xf71   :  { %v1773_v12 = vadd.f32 %v1771_v10, %v1761_v4 }
 0xf72   :  { %v1772_v13 = vadd.f32 %v1770_v11, %v1756_v2 }
 0xf73   :  { %v1775_v48 = vmul.f32 0.7978846, %v1773_v12 }
 0xf74   :  { %v1774_v14 = vmul.f32 0.7978846, %v1772_v13 }
 0xf75   :  { %4585 = vtanh.f32 %v1775_v48 }
 0xf76   :  { %4587 = vtanh.f32 %v1774_v14 }
 0xf7f   :  { %v4586_v8 = vpop.eup %4585 }
 0xf80   :  { %v4588_v15 = vpop.eup %4587  ;;  %v1779_v16 = vadd.f32 1.0, %v4586_v8 }
 0xf81   :  { %v1778_v17 = vadd.f32 1.0, %v4588_v15 }
 0xf82   :  { %v1781_v20 = vmul.f32 %v1779_v16, %v1765_v18 }
 0xf83   :  { %v1780_v19 = vmul.f32 %v1778_v17, %v1764_v45 }
 0xf85   :  { %4244 = vmatprep.mubr.f32.mxu0 %v1780_v19 }
 0xf86   :  { %4245 = vmatmul.mubr.f32.vlgmr.msra.gmra.mrb[14].mxu0 %v1781_v20 }
 0xf87   :  { %4290 = vmatprep.mubr.msk.f32.mxu0 %vm4662_vm1, %v4661_v44 }
0x1059   :  { %v4246_v21 = vpop.f32.mrb[14].mxu0 }
0x105a   :  { %v1864_v22 = vpop.f32.mrb[15].mxu0  ;;  %v1874_v23 = vadd.f32 %v4246_v21, %v4978_v36 }
0x105b   :  { %v1873_v24 = vadd.f32 %v1864_v22, %v4980_v59 }
0x105c   :  { %v5067_v26 = vadd.f32 %v1877_v50, %v1874_v23 }
0x105d   :  { %v5065_v25 = vadd.f32 %v1877_v50, %v1873_v24 }
0x105e   :  { %v1890_v28 = vsel %vm48_vm0, %v5067_v26, 0.0 }
0x105f   :  { %v1887_v27 = vsel %vm48_vm0, %v5065_v25, 0.0 }
0x1060   :  { %1888 = vadd.xlane.f32.xlu1 %v1887_v27 }
0x1064   :  { %1891 = vadd.xlane.f32.xlu1 %v1890_v28 }
0x10ed   :  { %v1889_v30 = vpop.xlane.xlu1 %1888 }
0x10ee   :  { %v1893_v34 = vmul.f32 0.03125, %v1889_v30 }
0x10f0   :  { %v1895_v35 = vsub.f32 %v5065_v25, %v1893_v34 }
0x10f1   :  { %v1892_v37 = vpop.xlane.xlu1 %1891 }
0x10f2   :  { %v1894_v36 = vmul.f32 0.03125, %v1892_v37  ;;  %v1897_v38 = vmul.f32 %v1895_v35, %v1895_v35 }
0x10f4   :  { %v1896_v59 = vsub.f32 %v5067_v26, %v1894_v36  ;;  %v1899_v39 = vsel %vm48_vm0, %v1897_v38, 0.0 }
0x10f5   :  { %1900 = vadd.xlane.f32.xlu1 %v1899_v39 }
0x10f6   :  { %v1898_v40 = vmul.f32 %v1896_v59, %v1896_v59 }
0x10f8   :  { %v1902_v41 = vsel %vm48_vm0, %v1898_v40, 0.0 }
0x10f9   :  { %1903 = vadd.xlane.f32.xlu1 %v1902_v41 }
0x1182   :  { %v1901_v52 = vpop.xlane.xlu1 %1900 }
0x1183   :  { %v1905_v53 = vmul.f32 0.03125, %v1901_v52 }
0x1185   :  { %v1907_v54 = vadd.f32 1e-05, %v1905_v53 }
0x1186   :  { %v1904_v56 = vpop.xlane.xlu1 %1903 }
0x1187   :  { %4589 = vrsqrt.f32 %v1907_v54  ;;  %v1906_v57 = vmul.f32 0.03125, %v1904_v56 }
0x1189   :  { %v1908_v58 = vadd.f32 1e-05, %v1906_v57 }
0x118b   :  { %4591 = vrsqrt.f32 %v1908_v58 }
0x1191   :  { %v4590_v62 = vpop.eup %4589 }
0x1192   :  { %v1911_v63 = vmul.f32 %v4590_v62, %v1895_v35 }
0x1194   :  { %v1917_v1 = vmul.f32 %v1916_v61, %v1911_v63 }
0x1195   :  { %v4592_v4 = vpop.eup %4591 }
0x1196   :  { %v1912_v3 = vmul.f32 %v4592_v4, %v1896_v59  ;;  %v1923_v2 = vadd.f32 %v1922_v0, %v1917_v1 }
0x1198   :  { %v1918_v5 = vmul.f32 %v1916_v61, %v1912_v3  ;;  %4255 = vmatprep.mubr.msk.f32.mxu1 %vm48_vm0, %v1923_v2 }
0x119a   :  { %v1924_v6 = vadd.f32 %v1922_v0, %v1918_v5 }
0x119c   :  { %4256 = vmatmul.mubr.msk.f32.vlgmr.msra.gmra.mrb[24].mxu1 %vm48_vm0, %v1924_v6 }
0x119d   :  { %4260 = vmatprep.mubr.msk.f32.mxu1 %vm4662_vm1, %v4661_v44 }
0x126f   :  { %v4257_v10 = vpop.f32.mrb[24].mxu1 }
0x1270   :  { %v5106_v11 = vadd.f32 %v4257_v10, %v1933_v9  ;;  %v2006_v12 = vpop.f32.mrb[25].mxu1 }
0x1271   :  { %v5108_v13 = vadd.f32 %v2006_v12, %v1933_v9 }
0x1272   :  { %2093 = vrot.lane.b32.xlu0 %v5106_v11, %s4663_s25 }
0x1273   :  { %2016 = vrot.lane.b32.xlu1 %v5108_v13, %s4663_s25 }
0x12e4   :  { %v2094_v14 = vpop.permute.xlu0 %2093 }
0x12e5   :  { %v2017_v48 = vpop.permute.xlu1 %2016 }
0x12e6   :  { %4259 = vmatpush3.xpose.msk.msra.mxu1 %vm180_vm2, %v2017_v48 }
0x12e7   :  { %4263 = vmatprep.subr.mxu1 %v4661_v44 }
0x12e9   :  { %4261 = vmatmul.mubr.msk.f32.vlgmr.msra.gmra.mrb[26].mxu1 %vm180_vm2, %v5108_v13 }
0x12ea   :  { %4264 = vmatpush3.xpose.msk.msra.mxu1 %vm180_vm2, %v2094_v14  ;;  %4265 = vmatprep.mubr.msk.f32.mxu1 %vm4662_vm1, %v4661_v44 }
0x12eb   :  { %4268 = vmatprep.subr.mxu1 %v4661_v44 }
0x12ed   :  { %4266 = vmatmul.mubr.msk.f32.vlgmr.msra.gmra.mrb[28].mxu1 %vm180_vm2, %v5106_v11 }
0x12ee   :  { %4270 = vmatprep.mubr.msk.f32.mxu1 %vm4662_vm1, %v4661_v44 }
0x13bc   :  { %v2088_v8 = vpop.f32.mrb[26].mxu1 }
0x13bd   :  { %v2169_v15 = vmul.f32 0.35355338, %v2088_v8  ;;  %v4262_v16 = vpop.f32.mrb[27].mxu1 }
0x13bf   :  { %v2171_v45 = vadd.f32 %v2169_v15, %v4812_v55 }
0x13c0   :  { %v2165_v17 = vpop.f32.mrb[28].mxu1 }
0x13c1   :  { %v2170_v18 = vmul.f32 0.35355338, %v2165_v17  ;;  %v4267_v19 = vpop.f32.mrb[29].mxu1  ;;  %v2173_v20 = vsel %vm180_vm2, %v2171_v45, -inf }
0x13c2   :  { %2174 = vmax.xlane.f32.xlu0 %v2173_v20 }
0x13c3   :  { %v2172_v21 = vadd.f32 %v2170_v18, %v4812_v55 }
0x13c5   :  { %v2176_v22 = vsel %vm180_vm2, %v2172_v21, -inf }
0x13c6   :  { %2177 = vmax.xlane.f32.xlu1 %v2176_v22 }
0x13d7   :  { %2271 = vrot.lane.b32.xlu1 %v5106_v11, %s4665_s26 }
0x13db   :  { %2349 = vrot.lane.b32.xlu1 %v5108_v13, %s4666_s27 }
0x13df   :  { %2427 = vrot.lane.b32.xlu1 %v5106_v11, %s4666_s27 }
0x144f   :  { %v2175_v50 = vpop.xlane.xlu0 %2174 }
0x1450   :  { %v2179_v23 = vsub.f32 %v2171_v45, %v2175_v50 }
0x1452   :  { %v2181_v24 = vmul.f32 1.442695, %v2179_v23 }
0x1453   :  { %v2178_v30 = vpop.xlane.xlu1 %2177 }
0x1454   :  { %4593 = vpow2.f32 %v2181_v24  ;;  %v2180_v34 = vsub.f32 %v2172_v21, %v2178_v30 }
0x1456   :  { %v2183_v35 = vmul.f32 1.442695, %v2180_v34 }
0x1457   :  { %v2272_v41 = vpop.permute.xlu1 %2271 }
0x1458   :  { %4595 = vpow2.f32 %v2183_v35 }
0x145b   :  { %v2350_v46 = vpop.permute.xlu1 %2349 }
0x145e   :  { %v4594_v27 = vpop.eup %4593 }
0x145f   :  { %v2185_v28 = vsel %vm180_vm2, %v4594_v27, 0.0  ;;  %v2428_v51 = vpop.permute.xlu1 %2427 }
0x1460   :  { %2186 = vadd.xlane.f32.xlu0 %v2185_v28 }
0x1462   :  { %v4596_v37 = vpop.eup %4595 }
0x1463   :  { %v2188_v36 = vsel %vm180_vm2, %v4596_v37, 0.0 }
0x1476   :  { %2195 = vrot.lane.b32.xlu0 %v5108_v13, %s4665_s26 }
0x1495   :  { %2189 = vadd.xlane.f32.xlu0 %v2188_v36 }
0x14ab   :  { %2347 = vrot.lane.b32.xlu0 %v5108_v13, %s4667_s28 }
0x14af   :  { %2425 = vrot.lane.b32.xlu0 %v5106_v11, %s4667_s28 }
0x14ed   :  { %v2187_v38 = vpop.xlane.xlu0 %2186 }
0x14ee   :  { %4597 = vrcp.f32 %v2187_v38 }
0x14f1   :  { %v2196_v59 = vpop.permute.xlu0 %2195 }
0x14f2   :  { %4269 = vmatpush3.msra.mxu1 %v2196_v59 }
0x14f3   :  { %4273 = vmatprep.subr.mxu1 %v4661_v44 }
0x14f8   :  { %v4598_v39 = vpop.eup %4597 }
0x14f9   :  { %v2192_v40 = vmul.f32 %v4598_v39, %v4594_v27 }
0x14fb   :  { %4271 = vmatmul.mubr.msk.f32.vlgmr.msra.gmra.mrb[30].mxu1 %vm180_vm2, %v2192_v40 }
0x14fc   :  { %4274 = vmatpush3.msra.mxu1 %v2272_v41  ;;  %4275 = vmatprep.mubr.msk.f32.mxu1 %vm4662_vm1, %v4661_v44 }
0x14fd   :  { %4278 = vmatprep.subr.mxu1 %v4661_v44 }
0x1522   :  { %v2190_v42 = vpop.xlane.xlu0 %2189 }
0x1523   :  { %4599 = vrcp.f32 %v2190_v42 }
0x1526   :  { %v2348_v49 = vpop.permute.xlu0 %2347 }
0x152a   :  { %v2426_v52 = vpop.permute.xlu0 %2425 }
0x152d   :  { %v4600_v43 = vpop.eup %4599 }
0x152e   :  { %v2194_v47 = vmul.f32 %v4600_v43, %v4596_v37 }
0x1530   :  { %4276 = vmatmul.mubr.msk.f32.vlgmr.msra.gmra.mrb[32].mxu1 %vm180_vm2, %v2194_v47 }
0x1531   :  { %4279 = vmatpush3.xpose.msk.msra.mxu1 %vm180_vm2, %v2350_v46  ;;  %4280 = vmatprep.mubr.msk.f32.mxu1 %vm4662_vm1, %v4661_v44 }
0x1532   :  { %4283 = vmatprep.subr.mxu1 %v4661_v44 }
0x1534   :  { %4281 = vmatmul.mubr.msk.f32.vlgmr.msra.gmra.mrb[34].mxu1 %vm180_vm2, %v2348_v49 }
0x1535   :  { %4284 = vmatpush3.xpose.msk.msra.mxu1 %vm180_vm2, %v2428_v51  ;;  %4285 = vmatprep.mubr.msk.f32.mxu1 %vm4662_vm1, %v4661_v44 }
0x1536   :  { %4293 = vmatprep.subr.mxu1 %v4661_v44 }
0x1538   :  { %4286 = vmatmul.mubr.msk.f32.vlgmr.msra.gmra.mrb[36].mxu1 %vm180_vm2, %v2426_v52 }
0x1539   :  { %4295 = vmatprep.mubr.msk.f32.mxu1 %vm4662_vm1, %v4661_v44 }
0x15ce   :  { %v5162_v53 = vpop.f32.mrb[30].mxu1 }
0x15cf   :  { %v4272_v54 = vpop.f32.mrb[31].mxu1 }
0x1603   :  { %v5164_v56 = vpop.f32.mrb[32].mxu1 }
0x1604   :  { %v4277_v57 = vpop.f32.mrb[33].mxu1 }
0x1607   :  { %v2421_v58 = vpop.f32.mrb[34].mxu1 }
0x1608   :  { %v2503_v60 = vmul.f32 0.35355338, %v2421_v58  ;;  %v4282_v61 = vpop.f32.mrb[35].mxu1 }
0x160a   :  { %v2505_v62 = vadd.f32 %v2503_v60, %v4812_v55 }
0x160b   :  { %v2499_v63 = vpop.f32.mrb[36].mxu1 }
0x160c   :  { %v2504_v0 = vmul.f32 0.35355338, %v2499_v63  ;;  %v4287_v1 = vpop.f32.mrb[37].mxu1  ;;  %v2507_v4 = vsel %vm180_vm2, %v2505_v62, -inf }
0x160d   :  { %2508 = vmax.xlane.f32.xlu1 %v2507_v4 }
0x160e   :  { %v2506_v3 = vadd.f32 %v2504_v0, %v4812_v55 }
0x1610   :  { %v2510_v2 = vsel %vm180_vm2, %v2506_v3, -inf }
0x1611   :  { %2511 = vmax.xlane.f32.xlu0 %v2510_v2 }
0x161e   :  { %2529 = vrot.lane.b32.xlu1 %v5108_v13, %s4668_s29 }
0x1622   :  { %2683 = vrot.lane.b32.xlu1 %v5108_v13, %s4669_s30 }
0x1626   :  { %2761 = vrot.lane.b32.xlu1 %v5106_v11, %s4669_s30 }
0x1627   :  { %2605 = vrot.lane.b32.xlu0 %v5106_v11, %s4668_s29 }
0x162a   :  { %2681 = vrot.lane.b32.xlu1 %v5108_v13, %s4670_s10 }
0x169a   :  { %v2509_v5 = vpop.xlane.xlu1 %2508 }
0x169b   :  { %v2513_v6 = vsub.f32 %v2505_v62, %v2509_v5 }
0x169d   :  { %v2515_v9 = vmul.f32 1.442695, %v2513_v6 }
0x169e   :  { %v2530_v10 = vpop.permute.xlu1 %2529  ;;  %v2512_v12 = vpop.xlane.xlu0 %2511 }
0x169f   :  { %4601 = vpow2.f32 %v2515_v9  ;;  %v2514_v48 = vsub.f32 %v2506_v3, %v2512_v12  ;;  %4289 = vmatpush3.msra.mxu0 %v2530_v10 }
0x16a0   :  { %4298 = vmatprep.subr.mxu0 %v4661_v44 }
0x16a1   :  { %v2517_v14 = vmul.f32 1.442695, %v2514_v48 }
0x16a2   :  { %v2606_v8 = vpop.permute.xlu0 %2605  ;;  %v2684_v20 = vpop.permute.xlu1 %2683 }
0x16a3   :  { %4603 = vpow2.f32 %v2517_v14  ;;  %4294 = vmatpush3.msra.mxu1 %v2606_v8 }
0x16a4   :  { %4303 = vmatprep.subr.mxu1 %v4661_v44 }
0x16a6   :  { %v2762_v22 = vpop.permute.xlu1 %2761 }
0x16a9   :  { %v4602_v15 = vpop.eup %4601 }
0x16aa   :  { %v2519_v16 = vsel %vm180_vm2, %v4602_v15, 0.0  ;;  %v2682_v27 = vpop.permute.xlu1 %2681 }
0x16ab   :  { %2520 = vadd.xlane.f32.xlu0 %v2519_v16 }
0x16ad   :  { %v4604_v45 = vpop.eup %4603 }
0x16ae   :  { %v2522_v17 = vsel %vm180_vm2, %v4604_v45, 0.0 }
0x16af   :  { %2523 = vadd.xlane.f32.xlu0 %v2522_v17 }
0x16c5   :  { %2759 = vrot.lane.b32.xlu0 %v5106_v11, %s4670_s10 }
0x1738   :  { %v2521_v18 = vpop.xlane.xlu0 %2520 }
0x1739   :  { %4605 = vrcp.f32 %v2521_v18 }
0x173c   :  { %v2524_v19 = vpop.xlane.xlu0 %2523 }
0x173d   :  { %4607 = vrcp.f32 %v2524_v19 }
0x1740   :  { %v2760_v28 = vpop.permute.xlu0 %2759 }
0x1743   :  { %v4606_v21 = vpop.eup %4605 }
0x1744   :  { %v2526_v50 = vmul.f32 %v4606_v21, %v4602_v15 }
0x1746   :  { %4291 = vmatmul.mubr.msk.f32.vlgmr.msra.gmra.mrb[16].mxu0 %vm180_vm2, %v2526_v50 }
0x1747   :  { %v4608_v23 = vpop.eup %4607  ;;  %4299 = vmatpush3.xpose.msk.msra.mxu0 %vm180_vm2, %v2684_v20  ;;  %4300 = vmatprep.mubr.msk.f32.mxu0 %vm4662_vm1, %v4661_v44 }
0x1748   :  { %v2528_v24 = vmul.f32 %v4608_v23, %v4604_v45  ;;  %4308 = vmatprep.subr.mxu0 %v4661_v44 }
0x174a   :  { %4296 = vmatmul.mubr.msk.f32.vlgmr.msra.gmra.mrb[38].mxu1 %vm180_vm2, %v2528_v24  ;;  %4301 = vmatmul.mubr.msk.f32.vlgmr.msra.gmra.mrb[18].mxu0 %vm180_vm2, %v2682_v27 }
0x174b   :  { %4304 = vmatpush3.xpose.msk.msra.mxu1 %vm180_vm2, %v2762_v22  ;;  %4305 = vmatprep.mubr.msk.f32.mxu1 %vm4662_vm1, %v4661_v44 }
0x174c   :  { %4313 = vmatprep.subr.mxu1 %v4661_v44  ;;  %4310 = vmatprep.mubr.msk.f32.mxu0 %vm4662_vm1, %v4661_v44 }
0x174e   :  { %4306 = vmatmul.mubr.msk.f32.vlgmr.msra.gmra.mrb[40].mxu1 %vm180_vm2, %v2760_v28 }
0x174f   :  { %4315 = vmatprep.mubr.msk.f32.mxu1 %vm4662_vm1, %v4661_v44 }
0x1819   :  { %v5202_v30 = vpop.f32.mrb[16].mxu0 }
0x181a   :  { %v4292_v34 = vpop.f32.mrb[17].mxu0 }
0x181d   :  { %v5204_v35 = vpop.f32.mrb[38].mxu1  ;;  %v2755_v37 = vpop.f32.mrb[18].mxu0 }
0x181e   :  { %v2837_v36 = vmul.f32 0.35355338, %v2755_v37  ;;  %v4297_v38 = vpop.f32.mrb[39].mxu1  ;;  %v4302_v59 = vpop.f32.mrb[19].mxu0 }
0x1820   :  { %v2839_v39 = vadd.f32 %v2837_v36, %v4812_v55 }
0x1821   :  { %v2833_v40 = vpop.f32.mrb[40].mxu1 }
0x1822   :  { %v2838_v41 = vmul.f32 0.35355338, %v2833_v40  ;;  %v4307_v42 = vpop.f32.mrb[41].mxu1  ;;  %v2841_v43 = vsel %vm180_vm2, %v2839_v39, -inf }
0x1823   :  { %2842 = vmax.xlane.f32.xlu1 %v2841_v43 }
0x1824   :  { %v2840_v46 = vadd.f32 %v2838_v41, %v4812_v55 }
0x1826   :  { %v2844_v47 = vsel %vm180_vm2, %v2840_v46, -inf }
0x1827   :  { %2845 = vmax.xlane.f32.xlu0 %v2844_v47 }
0x1834   :  { %2863 = vrot.lane.b32.xlu1 %v5108_v13, %s4671_s11 }
0x1838   :  { %3017 = vrot.lane.b32.xlu1 %v5108_v13, %s4672_s12 }
0x183c   :  { %3095 = vrot.lane.b32.xlu1 %v5106_v11, %s4672_s12  ;;  %s5421_s12 = smov 24  }
0x183d   :  { %2939 = vrot.lane.b32.xlu0 %v5106_v11, %s4671_s11 }
0x1840   :  { %3015 = vrot.lane.b32.xlu1 %v5108_v13, %s4673_s13 }
0x18b0   :  { %v2843_v49 = vpop.xlane.xlu1 %2842 }
0x18b1   :  { %v2847_v51 = vsub.f32 %v2839_v39, %v2843_v49  ;;  %v3927_v49 = vld [vmem:[%s5413_s4 + $0x28] sm:$0xff] }
0x18b3   :  { %v2849_v52 = vmul.f32 1.442695, %v2847_v51 }
0x18b4   :  { %v2864_v54 = vpop.permute.xlu1 %2863  ;;  %v2846_v57 = vpop.xlane.xlu0 %2845 }
0x18b5   :  { %4609 = vpow2.f32 %v2849_v52  ;;  %v2848_v58 = vsub.f32 %v2840_v46, %v2846_v57  ;;  %4309 = vmatpush3.msra.mxu0 %v2864_v54  ;;  %v3928_v52 = vld [vmem:[%s5413_s4 + $0x30] sm:$0xff]  ;;  %v3929_v54 = vld [vmem:[%s5413_s4 + $0x38] sm:$0xff] }
0x18b6   :  { %4318 = vmatprep.subr.mxu0 %v4661_v44  ;;  %v4474_v57 = vpack.c.bf16 %v3929_v54, %v3928_v52 }
0x18b7   :  { %v2851_v60 = vmul.f32 1.442695, %v2848_v58 }
0x18b8   :  { %v2940_v61 = vpop.permute.xlu0 %2939  ;;  %v3018_v2 = vpop.permute.xlu1 %3017 }
0x18b9   :  { %4611 = vpow2.f32 %v2851_v60  ;;  %4314 = vmatpush3.msra.mxu1 %v2940_v61 }
0x18ba   :  { %4323 = vmatprep.subr.mxu1 %v4661_v44 }
0x18bc   :  { %v3096_v6 = vpop.permute.xlu1 %3095 }
0x18bf   :  { %v4610_v62 = vpop.eup %4609 }
0x18c0   :  { %v2853_v63 = vsel %vm180_vm2, %v4610_v62, 0.0  ;;  %v3016_v48 = vpop.permute.xlu1 %3015 }
0x18c1   :  { %2854 = vadd.xlane.f32.xlu0 %v2853_v63 }
0x18c3   :  { %v4612_v0 = vpop.eup %4611 }
0x18c4   :  { %v2856_v1 = vsel %vm180_vm2, %v4612_v0, 0.0 }
0x18c5   :  { %2857 = vadd.xlane.f32.xlu0 %v2856_v1 }
0x18db   :  { %3093 = vrot.lane.b32.xlu0 %v5106_v11, %s4673_s13 }
0x194e   :  { %v2855_v4 = vpop.xlane.xlu0 %2854 }
0x194f   :  { %4613 = vrcp.f32 %v2855_v4 }
0x1952   :  { %v2858_v3 = vpop.xlane.xlu0 %2857 }
0x1953   :  { %4615 = vrcp.f32 %v2858_v3 }
0x1956   :  { %v3094_v14 = vpop.permute.xlu0 %3093 }
0x1959   :  { %v4614_v5 = vpop.eup %4613 }
0x195a   :  { %v2860_v9 = vmul.f32 %v4614_v5, %v4610_v62 }
0x195c   :  { %4311 = vmatmul.mubr.msk.f32.vlgmr.msra.gmra.mrb[20].mxu0 %vm180_vm2, %v2860_v9 }
0x195d   :  { %v4616_v10 = vpop.eup %4615  ;;  %4319 = vmatpush3.xpose.msk.msra.mxu0 %vm180_vm2, %v3018_v2  ;;  %4320 = vmatprep.mubr.msk.f32.mxu0 %vm4662_vm1, %v4661_v44 }
0x195e   :  { %v2862_v12 = vmul.f32 %v4616_v10, %v4612_v0  ;;  %4328 = vmatprep.subr.mxu0 %v4661_v44 }
0x1960   :  { %4316 = vmatmul.mubr.msk.f32.vlgmr.msra.gmra.mrb[42].mxu1 %vm180_vm2, %v2862_v12  ;;  %4321 = vmatmul.mubr.msk.f32.vlgmr.msra.gmra.mrb[22].mxu0 %vm180_vm2, %v3016_v48 }
0x1961   :  { %4324 = vmatpush3.xpose.msk.msra.mxu1 %vm180_vm2, %v3096_v6  ;;  %4325 = vmatprep.mubr.msk.f32.mxu1 %vm4662_vm1, %v4661_v44 }
0x1962   :  { %4333 = vmatprep.subr.mxu1 %v4661_v44  ;;  %4330 = vmatprep.mubr.msk.f32.mxu0 %vm4662_vm1, %v4661_v44 }
0x1964   :  { %4326 = vmatmul.mubr.msk.f32.vlgmr.msra.gmra.mrb[44].mxu1 %vm180_vm2, %v3094_v14 }
0x1965   :  { %4335 = vmatprep.mubr.msk.f32.mxu1 %vm4662_vm1, %v4661_v44 }
0x1a2f   :  { %v2935_v8 = vpop.f32.mrb[20].mxu0 }
0x1a30   :  { %v4312_v15 = vpop.f32.mrb[21].mxu0 }
0x1a33   :  { %v3011_v16 = vpop.f32.mrb[42].mxu1  ;;  %v3089_v45 = vpop.f32.mrb[22].mxu0 }
0x1a34   :  { %v3171_v17 = vmul.f32 0.35355338, %v3089_v45  ;;  %v4317_v18 = vpop.f32.mrb[43].mxu1  ;;  %v4322_v19 = vpop.f32.mrb[23].mxu0 }
0x1a36   :  { %v3173_v20 = vadd.f32 %v3171_v17, %v4812_v55 }
0x1a37   :  { %v3167_v21 = vpop.f32.mrb[44].mxu1 }
0x1a38   :  { %v3172_v22 = vmul.f32 0.35355338, %v3167_v21  ;;  %v4327_v50 = vpop.f32.mrb[45].mxu1  ;;  %v3175_v23 = vsel %vm180_vm2, %v3173_v20, -inf }
0x1a39   :  { %3176 = vmax.xlane.f32.xlu1 %v3175_v23 }
0x1a3a   :  { %v3174_v24 = vadd.f32 %v3172_v22, %v4812_v55 }
0x1a3c   :  { %v3178_v27 = vsel %vm180_vm2, %v3174_v24, -inf }
0x1a3d   :  { %3179 = vmax.xlane.f32.xlu0 %v3178_v27  ;;  %v3933_v27 = vld [vmem:[%s5414_s5 + $0x28] sm:$0xff] }
0x1a4a   :  { %3197 = vrot.lane.b32.xlu1 %v5108_v13, %s4674_s14 }
0x1a4e   :  { %3351 = vrot.lane.b32.xlu1 %v5202_v30, %s4675_s0 }
0x1a52   :  { %3353 = vrot.lane.b32.xlu1 %v5204_v35, %s4675_s0 }
0x1a56   :  { %3359 = vrot.lane.b32.xlu1 %v2935_v8, %s4676_s1 }
0x1ac6   :  { %v3177_v44 = vpop.xlane.xlu1 %3176 }
0x1ac7   :  { %v3181_v28 = vsub.f32 %v3173_v20, %v3177_v44 }
0x1ac9   :  { %v3183_v34 = vmul.f32 1.442695, %v3181_v28  ;;  %v3934_v28 = vld [vmem:[%s5414_s5 + $0x30] sm:$0xff] }
0x1aca   :  { %v3198_v37 = vpop.permute.xlu1 %3197  ;;  %v3180_v36 = vpop.xlane.xlu0 %3179 }
0x1acb   :  { %4617 = vpow2.f32 %v3183_v34  ;;  %v3182_v55 = vsub.f32 %v3174_v24, %v3180_v36  ;;  %4329 = vmatpush3.msra.mxu0 %v3198_v37  ;;  %v3932_v24 = vld [vmem:[%s5414_s5 + $0x20] sm:$0xff]  ;;  %v3935_v34 = vld [vmem:[%s5414_s5 + $0x38] sm:$0xff] }
0x1acc   :  { %v4478_v44 = vpack.c.bf16 %v3933_v27, %v3932_v24  ;;  %v4482_v37 = vpack.c.bf16 %v3935_v34, %v3934_v28  ;;  %v3938_v36 = vld [vmem:[%s5415_s6 + $0x80] sm:$0xff] }
0x1acd   :  { %v3185_v38 = vmul.f32 1.442695, %v3182_v55  ;;  %v3939_v55 = vld [vmem:[%s5415_s6 + $0x88] sm:$0xff] }
0x1ace   :  { %v3352_v63 = vpop.permute.xlu1 %3351 }
0x1acf   :  { %4619 = vpow2.f32 %v3185_v38  ;;  %v3373_v4 = vsel %vm180_vm2, %v5162_v53, %v3352_v63  ;;  %v3470_v53 = vrot.slane %v5102_v7, %v1633_v32  ;;  %v4486_v38 = vpack.c.bf16 %v3939_v55, %v3938_v36  ;;  %v3943_v63 = vld [vmem:[%s5415_s6 + $0xa8] sm:$0xff] }
0x1ad2   :  { %v3354_v0 = vpop.permute.xlu1 %3353 }
0x1ad3   :  { %v3374_v9 = vsel %vm180_vm2, %v5164_v56, %v3354_v0 }
0x1ad5   :  { %v4618_v59 = vpop.eup %4617 }
0x1ad6   :  { %v3187_v13 = vsel %vm180_vm2, %v4618_v59, 0.0  ;;  %v3360_v1 = vpop.permute.xlu1 %3359 }
0x1ad7   :  { %3188 = vadd.xlane.f32.xlu0 %v3187_v13  ;;  %v3375_v3 = vsel %vm1538_vm5, %v3373_v4, %v3360_v1  ;;  %v3944_v1 = vld [vmem:[%s5415_s6 + $0xb0] sm:$0xff]  ;;  %v3945_v4 = vld [vmem:[%s5415_s6 + $0xb8] sm:$0xff] }
0x1ad9   :  { %v4620_v30 = vpop.eup %4619 }
0x1ada   :  { %v3190_v39 = vsel %vm180_vm2, %v4620_v30, 0.0 }
0x1adb   :  { %3191 = vadd.xlane.f32.xlu0 %v3190_v39 }
0x1af1   :  { %3273 = vrot.lane.b32.xlu0 %v5106_v11, %s4674_s14  ;;  %v3926_v11 = vld [vmem:[%s5413_s4 + $0x20] sm:$0xff] }
0x1af2   :  { %v4470_v51 = vpack.c.bf16 %v3927_v49, %v3926_v11 }
0x1af4   :  { %4471 = vmatprep.subr.bf16.mxu0 %v4470_v51 }
0x1af5   :  { %3361 = vrot.lane.b32.xlu0 %v3011_v16, %s4676_s1 }
0x1b64   :  { %v3189_v35 = vpop.xlane.xlu0 %3188 }
0x1b65   :  { %4621 = vrcp.f32 %v3189_v35 }
0x1b68   :  { %v3192_v40 = vpop.xlane.xlu0 %3191 }
0x1b69   :  { %4623 = vrcp.f32 %v3192_v40 }
0x1b6c   :  { %v3274_v41 = vpop.permute.xlu0 %3273 }
0x1b6d   :  { %4334 = vmatpush3.msra.mxu1 %v3274_v41  ;;  %v3894_v41 = vld [vmem:[%s5411_s2 + $0x6] sm:$0x3] }
0x1b6e   :  { %4479 = vmatprep.subr.bf16.mxu1 %v4478_v44 }
0x1b6f   :  { %v4622_v42 = vpop.eup %4621 }
0x1b70   :  { %v3194_v43 = vmul.f32 %v4622_v42, %v4618_v59  ;;  %v3362_v2 = vpop.permute.xlu0 %3361  ;;  %v3502_v42 = vrot.slane %v3894_v41, %v4766_v31 }
0x1b71   :  { %v3376_v10 = vsel %vm1538_vm5, %v3374_v9, %v3362_v2  ;;  %v3946_v2 = vld [vmem:[%s5415_s6 + $0xc0] sm:$0xff]  ;;  %v3948_v9 = vld [vmem:[%s5415_s6 + $0xd0] sm:$0xff] }
0x1b72   :  { %4331 = vmatmul.mubr.msk.f32.vlgmr.msra.gmra.mrb[24].mxu0 %vm180_vm2, %v3194_v43 }
0x1b73   :  { %v4624_v46 = vpop.eup %4623  ;;  %4473 = vmatpush3.bf16.msra.mxu0 %v4470_v51 }
0x1b74   :  { %v3196_v47 = vmul.f32 %v4624_v46, %v4620_v30  ;;  %4475 = vmatprep.subr.bf16.mxu0 %v4474_v57 }
0x1b76   :  { %4336 = vmatmul.mubr.msk.f32.vlgmr.msra.gmra.mrb[46].mxu1 %vm180_vm2, %v3196_v47  ;;  %v3508_v47 = vrot.slane %v3894_v41, %v4772_v33 }
0x1b77   :  { %4477 = vmatpush3.bf16.msra.mxu0 %v4474_v57  ;;  %4481 = vmatpush3.bf16.msra.mxu1 %v4478_v44 }
0x1b78   :  { %4483 = vmatprep.subr.bf16.mxu1 %v4482_v37  ;;  %4487 = vmatprep.subr.bf16.mxu0 %v4486_v38 }
0x1b7b   :  { %4485 = vmatpush3.bf16.msra.mxu1 %v4482_v37 }
0x1c45   :  { %v3269_v58 = vpop.f32.mrb[24].mxu0 }
0x1c46   :  { %3367 = vrot.lane.b32.xlu1 %v3269_v58, %s5421_s12  ;;  %v4332_v60 = vpop.f32.mrb[25].mxu0  ;;  %v3940_v58 = vld [vmem:[%s5415_s6 + $0x90] sm:$0xff] }
0x1c47   :  { %v3941_v60 = vld [vmem:[%s5415_s6 + $0x98] sm:$0xff] }
0x1c49   :  { %v3345_v61 = vpop.f32.mrb[46].mxu1 }
0x1c4a   :  { %3369 = vrot.lane.b32.xlu0 %v3345_v61, %s5421_s12  ;;  %v4337_v62 = vpop.f32.mrb[47].mxu1  ;;  %v4490_v61 = vpack.c.bf16 %v3941_v60, %v3940_v58  ;;  %v3759_v60 = vld [vmem:[%s5417_s8] sm:$0xff] }
0x1c4b   :  { %v3942_v62 = vld [vmem:[%s5415_s6 + $0xa0] sm:$0xff] }
0x1c4c   :  { %v4494_v0 = vpack.c.bf16 %v3943_v63, %v3942_v62  ;;  %v3761_v63 = vld [vmem:[%s5417_s8 + $0x10] sm:$0xff] }
0x1cb8   :  { %v3368_v5 = vpop.permute.xlu1 %3367 }
0x1cb9   :  { %v3377_v6 = vsel %vm1541_vm4, %v3375_v3, %v3368_v5  ;;  %v4498_v3 = vpack.c.bf16 %v3945_v4, %v3944_v1  ;;  %v3947_v5 = vld [vmem:[%s5415_s6 + $0xc8] sm:$0xff] }
0x1cba   :  { %4346 = vmatprep.mubr.msk.f32.mxu0 %vm48_vm0, %v3377_v6  ;;  %v4502_v6 = vpack.c.bf16 %v3947_v5, %v3946_v2 }
0x1cbc   :  { %v3370_v12 = vpop.permute.xlu0 %3369 }
0x1cbd   :  { %v3378_v48 = vsel %vm1541_vm4, %v3376_v10, %v3370_v12  ;;  %v3949_v10 = vld [vmem:[%s5415_s6 + $0xd8] sm:$0xff] }
0x1cbe   :  { %4347 = vmatmul.mubr.msk.f32.vlgmr.msra.gmra.mrb[26].mxu0 %vm48_vm0, %v3378_v48  ;;  %v4506_v12 = vpack.c.bf16 %v3949_v10, %v3948_v9  ;;  %v3950_v48 = vld [vmem:[%s5415_s6 + $0xe0] sm:$0xff]  ;;  %v3954_v10 = vld [vmem:[%s5411_s2 + $0x8] sm:$0x3] }
0x1cbf   :  { %4489 = vmatpush3.bf16.msra.mxu0 %v4486_v38 }
0x1cc0   :  { %4491 = vmatprep.subr.bf16.mxu0 %v4490_v61 }
0x1cc3   :  { %4493 = vmatpush3.bf16.msra.mxu0 %v4490_v61  ;;  %v3760_v61 = vld [vmem:[%s5417_s8 + $0x8] sm:$0xff] }
0x1cc4   :  { %4495 = vmatprep.subr.bf16.mxu0 %v4494_v0  ;;  %v4518_v62 = vpack.c.bf16 %v3760_v61, %v3759_v60 }
0x1cc6   :  { %4519 = vmatprep.subr.bf16.mxu1 %v4518_v62 }
0x1cc7   :  { %4497 = vmatpush3.bf16.msra.mxu0 %v4494_v0  ;;  %v3762_v0 = vld [vmem:[%s5417_s8 + $0x18] sm:$0xff]  ;;  %s4678_s8 = smov [#allocation2]  }
0x1cc8   :  { %4499 = vmatprep.subr.bf16.mxu0 %v4498_v3  ;;  %v4522_v1 = vpack.c.bf16 %v3762_v0, %v3761_v63  ;;  %s3851_s12 = sshll.u32 %s4678_s8, 4  ;;  %s3852_s12 = int_to_ptr.vmem [resolvable:$true] %s3851_s12 }
0x1cc9   :  { %s4637_s2 = scalar_lea.vmem %s3852_s12, 256  ;;  %p4642_p1 = scmp.lt.s32.totalorder %s3852_s12, %s3852_s12 }
0x1cca   :  { %p4638_p0 = scmp.ne.s32.totalorder %s3852_s12, %s4637_s2  ;;  %p4643_p2 = scmp.lt.s32.totalorder %s4637_s2, %s4637_s2 }
0x1ccb   :  { %4501 = vmatpush3.bf16.msra.mxu0 %v4498_v3 }
0x1ccc   :  { %4503 = vmatprep.subr.bf16.mxu0 %v4502_v6  ;;  %p4644_p3 = por %p4643_p2, %p4642_p1 }
0x1cce   :  { %p4645_p4 = pnand %p4644_p3, %p4638_p0 }
0x1ccf   :  { %4505 = vmatpush3.bf16.msra.mxu0 %v4502_v6 }
0x1cd0   :  { %4507 = vmatprep.subr.bf16.mxu0 %v4506_v12 }
0x1cd3   :  { %4509 = vmatpush3.bf16.msra.mxu0 %v4506_v12  ;;  %v3750_v12 = vrot.slane %v3954_v10, %v4766_v31 }
0x1d91   :  { %v4348_v14 = vpop.f32.mrb[26].mxu0 }
0x1d92   :  { %v3466_v8 = vadd.f32 %v4348_v14, %v5067_v26  ;;  %v3456_v15 = vpop.f32.mrb[27].mxu0 }
0x1d93   :  { %v3465_v16 = vadd.f32 %v3456_v15, %v5065_v25  ;;  %v3953_v15 = vld [vmem:[%s5415_s6 + $0xf8] sm:$0xff] }
0x1d94   :  { %v5289_v45 = vadd.f32 %v3470_v53, %v3466_v8  ;;  %v3952_v8 = vld [vmem:[%s5415_s6 + $0xf0] sm:$0xff] }
0x1d95   :  { %v5291_v56 = vadd.f32 %v3470_v53, %v3465_v16  ;;  %v4514_v16 = vpack.c.bf16 %v3953_v15, %v3952_v8 }
0x1d96   :  { %v3476_v17 = vsel %vm48_vm0, %v5289_v45, 0.0 }
0x1d97   :  { %3477 = vadd.xlane.f32.xlu0 %v3476_v17  ;;  %v3473_v18 = vsel %vm48_vm0, %v5291_v56, 0.0  ;;  %v3519_v17 = vrot.slane %v5102_v7, %v4772_v33 }
0x1d98   :  { %3474 = vadd.xlane.f32.xlu1 %v3473_v18 }
0x1da9   :  { %3714 = vrot.lane.b32.xlu1 %v3470_v53, %s4663_s25  ;;  %v3951_v53 = vld [vmem:[%s5415_s6 + $0xe8] sm:$0xff] }
0x1daa   :  { %v4510_v14 = vpack.c.bf16 %v3951_v53, %v3950_v48 }
0x1dac   :  { %4511 = vmatprep.subr.bf16.mxu0 %v4510_v14 }
0x1dad   :  { %4513 = vmatpush3.bf16.msra.mxu0 %v4510_v14  ;;  %v3756_v14 = vrot.slane %v3954_v10, %v4772_v33 }
0x1dae   :  { %4515 = vmatprep.subr.bf16.mxu0 %v4514_v16 }
0x1db1   :  { %4517 = vmatpush3.bf16.msra.mxu0 %v4514_v16 }
0x1e24   :  { %v3478_v29 = vpop.xlane.xlu0 %3477 }
0x1e25   :  { %v3480_v32 = vmul.f32 0.03125, %v3478_v29  ;;  %v3475_v26 = vpop.xlane.xlu1 %3474 }
0x1e26   :  { %v3479_v19 = vmul.f32 0.03125, %v3475_v26 }
0x1e27   :  { %v3482_v25 = vsub.f32 %v5289_v45, %v3480_v32 }
0x1e28   :  { %v3481_v20 = vsub.f32 %v5291_v56, %v3479_v19 }
0x1e29   :  { %v3484_v50 = vmul.f32 %v3482_v25, %v3482_v25 }
0x1e2a   :  { %v3483_v21 = vmul.f32 %v3481_v20, %v3481_v20 }
0x1e2b   :  { %v3488_v23 = vsel %vm48_vm0, %v3484_v50, 0.0 }
0x1e2c   :  { %v3485_v22 = vsel %vm48_vm0, %v3483_v21, 0.0 }
0x1e2d   :  { %3486 = vadd.xlane.f32.xlu0 %v3485_v22 }
0x1e31   :  { %3489 = vadd.xlane.f32.xlu0 %v3488_v23 }
0x1eba   :  { %v3487_v59 = vpop.xlane.xlu0 %3486 }
0x1ebb   :  { %v3491_v13 = vmul.f32 0.03125, %v3487_v59 }
0x1ebd   :  { %v3493_v30 = vadd.f32 1e-05, %v3491_v13 }
0x1ebe   :  { %v3490_v39 = vpop.xlane.xlu0 %3489 }
0x1ebf   :  { %4625 = vrsqrt.f32 %v3493_v30  ;;  %v3492_v35 = vmul.f32 0.03125, %v3490_v39  ;;  %v3715_v39 = vpop.permute.xlu1 %3714 }
0x1ec1   :  { %v3494_v40 = vadd.f32 1e-05, %v3492_v35 }
0x1ec3   :  { %4627 = vrsqrt.f32 %v3494_v40 }
0x1ec9   :  { %v4626_v43 = vpop.eup %4625 }
0x1eca   :  { %v3497_v46 = vmul.f32 %v4626_v43, %v3481_v20 }
0x1ecc   :  { %v3503_v11 = vmul.f32 %v3502_v42, %v3497_v46 }
0x1ecd   :  { %v4628_v49 = vpop.eup %4627 }
0x1ece   :  { %v3498_v51 = vmul.f32 %v4628_v49, %v3482_v25  ;;  %v3509_v52 = vadd.f32 %v3508_v47, %v3503_v11 }
0x1ed0   :  { %v3504_v54 = vmul.f32 %v3502_v42, %v3498_v51  ;;  %4357 = vmatprep.mubr.msk.f32.mxu1 %vm48_vm0, %v3509_v52 }
0x1ed2   :  { %v3510_v57 = vadd.f32 %v3508_v47, %v3504_v54 }
0x1ed4   :  { %4358 = vmatmul.mubr.msk.f32.vlgmr.msra.gmra.mrb[48].mxu1 %vm48_vm0, %v3510_v57 }
0x1ed5   :  { %4521 = vmatpush3.bf16.msra.mxu1 %v4518_v62 }
0x1ed6   :  { %4523 = vmatprep.subr.bf16.mxu1 %v4522_v1 }
0x1ed9   :  { %4525 = vmatpush3.bf16.msra.mxu1 %v4522_v1 }
0x1fa7   :  { %v4359_v18 = vpop.f32.mrb[48].mxu1 }
0x1fa8   :  { %v3598_v29 = vadd.f32 %v4359_v18, %v3519_v17  ;;  %v3592_v32 = vpop.f32.mrb[49].mxu1 }
0x1fa9   :  { %v3593_v26 = vadd.f32 %v3592_v32, %v3519_v17 }
0x1faa   :  { %v3604_v19 = vmul.f32 0.044715, %v3598_v29  ;;  %v3602_v55 = vmul.f32 0.5, %v3598_v29 }
0x1fab   :  { %v3603_v25 = vmul.f32 0.044715, %v3593_v26  ;;  %v3601_v7 = vmul.f32 0.5, %v3593_v26 }
0x1fac   :  { %v3606_v20 = vmul.f32 %v3604_v19, %v3598_v29 }
0x1fad   :  { %v3605_v21 = vmul.f32 %v3603_v25, %v3593_v26 }
0x1fae   :  { %v3608_v22 = vmul.f32 %v3606_v20, %v3598_v29 }
0x1faf   :  { %v3607_v50 = vmul.f32 %v3605_v21, %v3593_v26 }
0x1fb0   :  { %v3610_v23 = vadd.f32 %v3608_v22, %v3598_v29 }
0x1fb1   :  { %v3609_v24 = vadd.f32 %v3607_v50, %v3593_v26 }
0x1fb2   :  { %v3612_v27 = vmul.f32 0.7978846, %v3610_v23 }
0x1fb3   :  { %v3611_v44 = vmul.f32 0.7978846, %v3609_v24 }
0x1fb4   :  { %4629 = vtanh.f32 %v3612_v27 }
0x1fb5   :  { %4631 = vtanh.f32 %v3611_v44 }
0x1fbe   :  { %v4630_v28 = vpop.eup %4629 }
0x1fbf   :  { %v4632_v34 = vpop.eup %4631  ;;  %v3616_v37 = vadd.f32 1.0, %v4630_v28 }
0x1fc0   :  { %v3615_v36 = vadd.f32 1.0, %v4632_v34 }
0x1fc1   :  { %v3618_v59 = vmul.f32 %v3616_v37, %v3602_v55 }
0x1fc2   :  { %v3617_v38 = vmul.f32 %v3615_v36, %v3601_v7 }
0x1fc4   :  { %4392 = vmatprep.mubr.f32.mxu0 %v3617_v38 }
0x1fc5   :  { %4393 = vmatmul.mubr.f32.vlgmr.msra.gmra.mrb[28].mxu0 %v3618_v59 }
0x2098   :  { %v4394_v13 = vpop.f32.mrb[28].mxu0 }
0x2099   :  { %v3702_v30 = vpop.f32.mrb[29].mxu0  ;;  %v3712_v35 = vadd.f32 %v4394_v13, %v5289_v45 }
0x209a   :  { %v3711_v40 = vadd.f32 %v3702_v30, %v5291_v56 }
0x209b   :  { %v3718_v42 = vadd.f32 %v3715_v39, %v3712_v35 }
0x209c   :  { %v3717_v41 = vadd.f32 %v3715_v39, %v3711_v40 }
0x209d   :  { %v3724_v46 = vsel %vm48_vm0, %v3718_v42, 0.0 }
0x209e   :  { %v3721_v43 = vsel %vm48_vm0, %v3717_v41, 0.0 }
0x209f   :  { %3722 = vadd.xlane.f32.xlu0 %v3721_v43 }
0x20a3   :  { %3725 = vadd.xlane.f32.xlu0 %v3724_v46 }
0x212c   :  { %v3723_v47 = vpop.xlane.xlu0 %3722 }
0x212d   :  { %v3727_v11 = vmul.f32 0.03125, %v3723_v47 }
0x212f   :  { %v3729_v49 = vsub.f32 %v3717_v41, %v3727_v11 }
0x2130   :  { %v3726_v51 = vpop.xlane.xlu0 %3725 }
0x2131   :  { %v3728_v52 = vmul.f32 0.03125, %v3726_v51  ;;  %v3731_v54 = vmul.f32 %v3729_v49, %v3729_v49 }
0x2133   :  { %v3730_v57 = vsub.f32 %v3718_v42, %v3728_v52  ;;  %v3733_v58 = vsel %vm48_vm0, %v3731_v54, 0.0 }
0x2134   :  { %3734 = vadd.xlane.f32.xlu0 %v3733_v58 }
0x2135   :  { %v3732_v45 = vmul.f32 %v3730_v57, %v3730_v57 }
0x2137   :  { %v3736_v56 = vsel %vm48_vm0, %v3732_v45, 0.0 }
0x2138   :  { %3737 = vadd.xlane.f32.xlu0 %v3736_v56 }
0x21c1   :  { %v3735_v4 = vpop.xlane.xlu0 %3734 }
0x21c2   :  { %v3739_v3 = vmul.f32 0.03125, %v3735_v4 }
0x21c4   :  { %v3741_v2 = vadd.f32 1e-05, %v3739_v3 }
0x21c5   :  { %v3738_v5 = vpop.xlane.xlu0 %3737 }
0x21c6   :  { %4633 = vrsqrt.f32 %v3741_v2  ;;  %v3740_v6 = vmul.f32 0.03125, %v3738_v5 }
0x21c8   :  { %v3742_v9 = vadd.f32 1e-05, %v3740_v6 }
0x21ca   :  { %4635 = vrsqrt.f32 %v3742_v9 }
0x21d0   :  { %v4634_v48 = vpop.eup %4633 }
0x21d1   :  { %v3745_v53 = vmul.f32 %v4634_v48, %v3729_v49 }
0x21d3   :  { %v3751_v8 = vmul.f32 %v3750_v12, %v3745_v53 }
0x21d4   :  { %v4636_v15 = vpop.eup %4635 }
0x21d5   :  { %v3746_v16 = vmul.f32 %v4636_v15, %v3730_v57  ;;  %v3757_v17 = vadd.f32 %v3756_v14, %v3751_v8 }
0x21d7   :  { %v3752_v18 = vmul.f32 %v3750_v12, %v3746_v16  ;;  %4403 = vmatprep.mubr.msk.f32.mxu1 %vm48_vm0, %v3757_v17 }
0x21d9   :  { %v3758_v29 = vadd.f32 %v3756_v14, %v3752_v18 }
0x21db   :  { %4404 = vmatmul.mubr.msk.f32.vlgmr.msra.gmra.mrb[50].mxu1 %vm48_vm0, %v3758_v29 }
0x22ae   :  { %v4405_v32 = vpop.f32.mrb[50].mxu1 }
0x22af   :  { %3845 = vst [vmem:[#allocation2 + $0x8] sm:$0xff] %v4405_v32  ;;  %v3835_v31 = vpop.f32.mrb[51].mxu1 }
0x22b0   :  { %3844 = vst [vmem:[#allocation2] sm:$0xff] %v3835_v31 }
0x22b1   :  { %4648 = shalt.err (!%p4645_p4)
}
0x22b2   :  { %s4649_s25 = scalar_lea.hbm %s5418_s9, 256 }
0x22b3   :  { %p4650_p5 = scmp.ne.s32.totalorder %s5418_s9, %s4649_s25  ;;  %p4653_p6 = scmp.lt.u32.totalorder %s4649_s25, %s5418_s9 }
0x22b5   :  { %p4655_p7 = pnand %p4653_p6, %p4650_p5 }
0x22b7   :  { %4658 = shalt.err (!%p4655_p7)
}
0x22b8   :  { %s4679_s23 = smov 128  }
0x22b9   :  { %3857 = dma.vmem_to_hbm [thread:$0]  %s3852_s12, 256, %s5418_s9, [#allocation3], %s4679_s23, %s4679_s23, %s4675_s0  }
0x22ba   :  { %4659 = dma.done.wait [#allocation3], 256  }
0x22bb   :  { %4660 = vsyncadd [#allocation3], 4294967040 }
0x22bc   :  { %3861 = vsyncpa [#allocation3], 1 }

</bundles_post_ra>
